<compile_context>
chip_gen: v7x
topology: tpu7x:2x2x1
jax: 0.10.0
libtpu: 0.0.40
codegen_flags: <defaults>
</compile_context>

<pallas_src>
import functools
import math

import jax
import jax.numpy as jnp
import numpy as np
from jax import lax
from jax.experimental import pallas as pl
from jax.experimental.pallas import tpu as pltpu

LN_EPS = 1e-5          # PyTorch LayerNorm default eps
NEG_INF = -1e30        # finite stand-in for -inf attention bias (exp() -> 0)


# ---------------------------------------------------------------------------
# In-kernel math helpers (VPU / EUP / XLU friendly)
# ---------------------------------------------------------------------------
def _erf(x):
    # Abramowitz & Stegun 7.1.26 polynomial erf (max abs err ~1.5e-7).
    a1, a2, a3, a4, a5 = (0.254829592, -0.284496736, 1.421413741,
                          -1.453152027, 1.061405429)
    p = 0.3275911
    sgn = jnp.where(x >= 0.0, 1.0, -1.0)
    ax = jnp.abs(x)
    t = 1.0 / (1.0 + p * ax)
    poly = ((((a5 * t + a4) * t + a3) * t + a2) * t + a1) * t
    return sgn * (1.0 - poly * jnp.exp(-ax * ax))


def _gelu_exact(x):
    # PyTorch activation='gelu' => exact (erf) GELU
    return 0.5 * x * (1.0 + _erf(x * (1.0 / math.sqrt(2.0))))


def _layer_norm(x, gamma, beta):
    mu = jnp.mean(x, axis=-1, keepdims=True)
    var = jnp.mean(jnp.square(x - mu), axis=-1, keepdims=True)
    inv = lax.rsqrt(var + LN_EPS)
    return (x - mu) * inv * gamma + beta


# ---------------------------------------------------------------------------
# One encoder layer per grid step (grid=(L,), 'arbitrary').
#   bid_q_ref : (BS, 1)  f32 batch id per query row
#   bid_k_ref : (1, BS)  f32 batch id per key column
#   kpad_ref  : (1, BS)  f32 additive key-padding bias (0 or NEG_INF)
#   x_ref     : (BS, D)  f32 flattened input (only used at l == 0)
#   wqkv_ref  : (D, 3D)  bf16 fused QKV weight (scale folded into Q cols)
#   bqkv_ref  : (1, 3D)  f32
#   wo_ref    : (D, D)   bf16
#   w1_ref    : (D, F)   bf16,  b1_ref : (1, F) f32
#   w2_ref    : (F, D)   bf16
#   vecs_ref  : (6, D)   f32 rows = [bo, b2, ln1_g, ln1_b, ln2_g, ln2_b]
#   o_ref     : (BS, D)  f32 resident activation carried across layers
# ---------------------------------------------------------------------------
def encoder_layer_kernel(bid_q_ref, bid_k_ref, kpad_ref, x_ref,
                         wqkv_ref, bqkv_ref, wo_ref, w1_ref, b1_ref, w2_ref,
                         vecs_ref, o_ref, *, n_heads):
    layer = pl.program_id(0)

    @pl.when(layer == 0)
    def _():
        o_ref[...] = x_ref[...]

    x = o_ref[...]                           # (BS, D) f32
    bs, d_model = x.shape
    dh = d_model // n_heads

    # Block-diagonal batch mask + key padding, built from O(BS) vectors (f32).
    # NOTE: a fully padded sequence yields a uniform softmax (average of V)
    # instead of PyTorch's NaN — documented semantic difference.
    bias = (jnp.where(bid_q_ref[...] == bid_k_ref[...], 0.0, NEG_INF)
            + kpad_ref[...])                 # (BS, BS) f32

    wqkv = wqkv_ref[...]
    bqkv = bqkv_ref[...]
    wo = wo_ref[...]
    w1 = w1_ref[...]
    b1 = b1_ref[...]
    w2 = w2_ref[...]
    vecs = vecs_ref[...]
    bo, b2 = vecs[0:1], vecs[1:2]
    ln1g, ln1b = vecs[2:3], vecs[3:4]
    ln2g, ln2b = vecs[4:5], vecs[5:6]

    # --- fused QKV projection: bf16 operands, f32 accumulation ---------------
    qkv = jnp.dot(x.astype(jnp.bfloat16), wqkv,
                  preferred_element_type=jnp.float32) + bqkv      # (BS, 3D) f32
    qkv_b = qkv.astype(jnp.bfloat16)

    # --- per-head attention: 2D matmuls only, no stack/concat relayouts ------
    attn = jnp.zeros((bs, d_model), jnp.float32)
    for h in range(n_heads):                                      # H is tiny & static
        qs = slice(h * dh, (h + 1) * dh)
        ks = slice(d_model + h * dh, d_model + (h + 1) * dh)
        vs = slice(2 * d_model + h * dh, 2 * d_model + (h + 1) * dh)

        s = jnp.einsum('qd,kd->qk', qkv_b[:, qs], qkv_b[:, ks],
                       preferred_element_type=jnp.float32)        # (BS, BS) f32
        s = s + bias
        s = s - jnp.max(s, axis=-1, keepdims=True)                # stable softmax
        p = jnp.exp(s)
        p = p * pl.reciprocal(jnp.sum(p, axis=-1, keepdims=True), approx=True)

        oh = jnp.dot(p.astype(jnp.bfloat16), qkv_b[:, vs],
                     preferred_element_type=jnp.float32)          # (BS, dh) f32
        # fold this head's output through its W_o row-block (replaces concat)
        attn = attn + jnp.dot(oh.astype(jnp.bfloat16), wo[qs, :],
                              preferred_element_type=jnp.float32)
    attn = attn + bo

    # --- residual + LayerNorm 1 (post-norm) ----------------------------------
    h1 = _layer_norm(x + attn, ln1g, ln1b)

    # --- position-wise feed-forward with exact GELU --------------------------
    ff = jnp.dot(h1.astype(jnp.bfloat16), w1,
                 preferred_element_type=jnp.float32) + b1
    ff = _gelu_exact(ff)
    ff = jnp.dot(ff.astype(jnp.bfloat16), w2,
                 preferred_element_type=jnp.float32) + b2

    # --- residual + LayerNorm 2 ----------------------------------------------
    o_ref[...] = _layer_norm(h1 + ff, ln2g, ln2b)
    # TODO(synk): dropout omitted (eval-mode identity).


# ---------------------------------------------------------------------------
# Wrapper: parameter packing, mask vectors, pallas_call
# ---------------------------------------------------------------------------
def pack_params(layer_params, n_heads):
    """Stack per-layer params into 7 arrays; weights in bf16, scale folded."""
    D = layer_params[0]["wq"].shape[0]
    dh = D // n_heads
    scale = 1.0 / math.sqrt(dh)

    def per_layer(p):
        wqkv = jnp.concatenate([p["wq"] * scale, p["wk"], p["wv"]], axis=1)
        bqkv = jnp.concatenate([p["bq"] * scale, p["bk"], p["bv"]], axis=1)
        vecs = jnp.concatenate([p["bo"], p["b2"], p["ln1g"], p["ln1b"],
                                p["ln2g"], p["ln2b"]], axis=0)
        return (wqkv.astype(jnp.bfloat16),
                bqkv.astype(jnp.float32),
                p["wo"].astype(jnp.bfloat16),
                p["w1"].astype(jnp.bfloat16),
                p["b1"].astype(jnp.float32),
                p["w2"].astype(jnp.bfloat16),
                vecs.astype(jnp.float32))

    cols = list(zip(*[per_layer(p) for p in layer_params]))
    names = ("wqkv", "bqkv", "wo", "w1", "b1", "w2", "vecs")
    return {n: jnp.stack(c, axis=0) for n, c in zip(names, cols)}


def _block_nbytes(arr, per_layer):
    shape = arr.shape[1:] if per_layer else arr.shape
    return int(np.prod(shape)) * int(arr.dtype.itemsize)


def encoder_forward(x, e_mask, stacked, n_heads):
    B, S, D = x.shape
    BS = B * S
    L = stacked["wqkv"].shape[0]
    F = stacked["w1"].shape[-1]

    x_flat = x.reshape(BS, D).astype(jnp.float32)
    bid = (jnp.arange(BS, dtype=jnp.int32) // S).astype(jnp.float32)
    bid_q = bid.reshape(BS, 1)
    bid_k = bid.reshape(1, BS)
    kpad = jnp.where(e_mask.reshape(1, BS), NEG_INF, 0.0).astype(jnp.float32)

    in_specs = [
        pl.BlockSpec((BS, 1), lambda l: (0, 0)),              # bid_q
        pl.BlockSpec((1, BS), lambda l: (0, 0)),              # bid_k
        pl.BlockSpec((1, BS), lambda l: (0, 0)),              # kpad
        pl.BlockSpec((BS, D), lambda l: (0, 0)),              # x (used at l==0)
        pl.BlockSpec((None, D, 3 * D), lambda l: (l, 0, 0)),  # wqkv
        pl.BlockSpec((None, 1, 3 * D), lambda l: (l, 0, 0)),  # bqkv
        pl.BlockSpec((None, D, D), lambda l: (l, 0, 0)),      # wo
        pl.BlockSpec((None, D, F), lambda l: (l, 0, 0)),      # w1
        pl.BlockSpec((None, 1, F), lambda l: (l, 0, 0)),      # b1
        pl.BlockSpec((None, F, D), lambda l: (l, 0, 0)),      # w2
        pl.BlockSpec((None, 6, D), lambda l: (l, 0, 0)),      # vecs
    ]
    out_spec = pl.BlockSpec((BS, D), lambda l: (0, 0))        # resident carry

    inputs = (bid_q, bid_k, kpad, x_flat,
              stacked["wqkv"], stacked["bqkv"], stacked["wo"],
              stacked["w1"], stacked["b1"], stacked["w2"], stacked["vecs"])

    # Derive the VMEM limit from actual per-step block sizes (2x for the
    # double-buffered pipeline) + headroom; never exceed v7x physical VMEM.
    per_step = sum(_block_nbytes(a, per_layer=(i >= 4))
                   for i, a in enumerate(inputs))
    per_step += BS * D * 4                                    # output block
    vmem_limit = int(min(2 * per_step + (16 << 20), 64 << 20))

    kernel = functools.partial(encoder_layer_kernel, n_heads=n_heads)
    out_flat = pl.pallas_call(
        kernel,
        out_shape=jax.ShapeDtypeStruct((BS, D), jnp.float32),
        grid=(L,),
        in_specs=in_specs,
        out_specs=out_spec,
        compiler_params=pltpu.CompilerParams(
            dimension_semantics=("arbitrary",),
            vmem_limit_bytes=vmem_limit),
    )(*inputs)
    return out_flat.reshape(B, S, D)


# ---------------------------------------------------------------------------
# Pure-JAX f32 reference (same architecture, used only to validate the kernel)
# ---------------------------------------------------------------------------
def ref_layer(x, mask_bias, p, n_heads):
    B, S, D = x.shape
    dh = D // n_heads
    q = (x @ p["wq"] + p["bq"]).reshape(B, S, n_heads, dh).transpose(0, 2, 1, 3)
    k = (x @ p["wk"] + p["bk"]).reshape(B, S, n_heads, dh).transpose(0, 2, 1, 3)
    v = (x @ p["wv"] + p["bv"]).reshape(B, S, n_heads, dh).transpose(0, 2, 1, 3)
    s = jnp.einsum("bhqd,bhkd->bhqk", q, k) / math.sqrt(dh)
    s = s + mask_bias[:, :, None, :]
    a = jax.nn.softmax(s, axis=-1)
    o = jnp.einsum("bhqk,bhkd->bhqd", a, v).transpose(0, 2, 1, 3).reshape(B, S, D)
    o = o @ p["wo"] + p["bo"]
    h1 = _layer_norm(x + o, p["ln1g"], p["ln1b"])
    ff = jax.nn.gelu(h1 @ p["w1"] + p["b1"], approximate=False)
    ff = ff @ p["w2"] + p["b2"]
    return _layer_norm(h1 + ff, p["ln2g"], p["ln2b"])


# ---------------------------------------------------------------------------
# Deterministic parameter init (shapes from nn.TransformerEncoderLayer)
# ---------------------------------------------------------------------------
def init_layer_params(key, D, F):
    ks = jax.random.split(key, 12)
    w = lambda k, shape, s=0.05: (s * jax.random.normal(k, shape)).astype(jnp.float32)
    return {
        "wq": w(ks[0], (D, D)), "bq": w(ks[1], (1, D)),
        "wk": w(ks[2], (D, D)), "bk": w(ks[3], (1, D)),
        "wv": w(ks[4], (D, D)), "bv": w(ks[5], (1, D)),
        "wo": w(ks[6], (D, D)), "bo": w(ks[7], (1, D)),
        "ln1g": jnp.ones((1, D), jnp.float32), "ln1b": jnp.zeros((1, D), jnp.float32),
        "w1": w(ks[8], (D, F)), "b1": w(ks[9], (1, F)),
        "w2": w(ks[10], (F, D)), "b2": w(ks[11], (1, D)),
        "ln2g": jnp.ones((1, D), jnp.float32), "ln2b": jnp.zeros((1, D), jnp.float32),
    }


if __name__ == "__main__":
    # config implied by the module: hidden_dim, n_heads, pff_dim, n_layers, dropout
    hidden_dim, n_heads, pff_dim, n_layers = 32, 4, 64, 2
    B, S = 2, 8

    key = jax.random.PRNGKey(0)
    kx, kp = jax.random.split(key)
    x = jax.random.normal(kx, (B, S, hidden_dim), dtype=jnp.float32)
    # True = padded position (ignored as attention key); last 2 keys of batch 1 padded
    e_mask = jnp.zeros((B, S), dtype=bool).at[1, S - 2:].set(True)

    # clones() deep-copies one layer => every layer starts with identical weights
    shared_params = init_layer_params(kp, hidden_dim, pff_dim)
    layer_params = [shared_params] * n_layers
    stacked = pack_params(layer_params, n_heads)

    out = encoder_forward(x, e_mask, stacked, n_heads)
    out = jax.block_until_ready(out)

    # validate against the pure-JAX f32 reference (tolerance covers bf16 matmuls)
    mb = jnp.where(e_mask, NEG_INF, 0.0).astype(jnp.float32)[:, None, :]
    ref = x
    for p in layer_params:
        ref = ref_layer(ref, mb, p, n_heads)
    np.testing.assert_allclose(np.asarray(out), np.asarray(ref), rtol=3e-2, atol=3e-2)

    print("KERNEL_OK")
</pallas_src>

<mosaic_0001>
module attributes {stable_mosaic.version = 11 : i64} {
  func.func @encoder_layer_kernel(%arg0: i32, %arg1: memref<16x1xf32, #tpu.memory_space<vmem>>, %arg2: memref<1x16xf32, #tpu.memory_space<vmem>>, %arg3: memref<1x16xf32, #tpu.memory_space<vmem>>, %arg4: memref<16x32xf32, #tpu.memory_space<vmem>>, %arg5: memref<1x32x96xbf16, #tpu.memory_space<vmem>>, %arg6: memref<1x1x96xf32, #tpu.memory_space<vmem>>, %arg7: memref<1x32x32xbf16, #tpu.memory_space<vmem>>, %arg8: memref<1x32x64xbf16, #tpu.memory_space<vmem>>, %arg9: memref<1x1x64xf32, #tpu.memory_space<vmem>>, %arg10: memref<1x64x32xbf16, #tpu.memory_space<vmem>>, %arg11: memref<1x6x32xf32, #tpu.memory_space<vmem>>, %arg12: memref<16x32xf32, #tpu.memory_space<vmem>>) attributes {dimension_semantics = [#tpu.dimension_semantics<arbitrary>], iteration_bounds = array<i64: 2>, scalar_prefetch = 0 : i64, scratch_operands = 0 : i64, tpu.core_type = #tpu.core_type<tc>, window_params = [{pipeline_mode = #tpu.pipeline_mode<synchronous>, transform_indices = @transform_0, window_bounds = array<i64: 16, 1>}, {pipeline_mode = #tpu.pipeline_mode<synchronous>, transform_indices = @transform_1, window_bounds = array<i64: 1, 16>}, {pipeline_mode = #tpu.pipeline_mode<synchronous>, transform_indices = @transform_2, window_bounds = array<i64: 1, 16>}, {pipeline_mode = #tpu.pipeline_mode<synchronous>, transform_indices = @transform_3, window_bounds = array<i64: 16, 32>}, {transform_indices = @transform_4, window_bounds = array<i64: 1, 32, 96>}, {transform_indices = @transform_5, window_bounds = array<i64: 1, 1, 96>}, {transform_indices = @transform_6, window_bounds = array<i64: 1, 32, 32>}, {transform_indices = @transform_7, window_bounds = array<i64: 1, 32, 64>}, {transform_indices = @transform_8, window_bounds = array<i64: 1, 1, 64>}, {transform_indices = @transform_9, window_bounds = array<i64: 1, 64, 32>}, {transform_indices = @transform_10, window_bounds = array<i64: 1, 6, 32>}, {pipeline_mode = #tpu.pipeline_mode<synchronous>, transform_indices = @transform_11, window_bounds = array<i64: 16, 32>}]} {
    %c0_i32 = arith.constant 0 : i32
    %0 = arith.cmpi eq, %arg0, %c0_i32 : i32
    %1 = arith.extui %0 : i1 to i32
    %c0_i32_0 = arith.constant 0 : i32
    %2 = arith.cmpi ne, %1, %c0_i32_0 : i32
    scf.if %2 {
      %c0_82 = arith.constant 0 : index
      %c0_83 = arith.constant 0 : index
      %223 = vector.load %arg4[%c0_82, %c0_83] : memref<16x32xf32, #tpu.memory_space<vmem>>, vector<16x32xf32>
      %c0_84 = arith.constant 0 : index
      %c0_85 = arith.constant 0 : index
      %224 = vector.load %arg12[%c0_84, %c0_85] : memref<16x32xf32, #tpu.memory_space<vmem>>, vector<16x32xf32>
      tpu.vector_store %arg12[%c0_84, %c0_85], %223 {strides = array<i32>} : memref<16x32xf32, #tpu.memory_space<vmem>>, vector<16x32xf32>,
    } else {
    }
    %c0 = arith.constant 0 : index
    %c0_1 = arith.constant 0 : index
    %3 = vector.load %arg12[%c0, %c0_1] : memref<16x32xf32, #tpu.memory_space<vmem>>, vector<16x32xf32>
    %c0_2 = arith.constant 0 : index
    %c0_3 = arith.constant 0 : index
    %4 = vector.load %arg1[%c0_2, %c0_3] : memref<16x1xf32, #tpu.memory_space<vmem>>, vector<16x1xf32>
    %c0_4 = arith.constant 0 : index
    %c0_5 = arith.constant 0 : index
    %5 = vector.load %arg2[%c0_4, %c0_5] : memref<1x16xf32, #tpu.memory_space<vmem>>, vector<1x16xf32>
    %6 = vector.broadcast %4 : vector<16x1xf32> to vector<16x16xf32>
    %7 = vector.broadcast %5 : vector<1x16xf32> to vector<16x16xf32>
    %8 = arith.cmpf oeq, %6, %7 : vector<16x16xf32>
    %cst = arith.constant 0.000000e+00 : f32
    %cst_6 = arith.constant -1.000000e+30 : f32
    %9 = vector.broadcast %cst : f32 to vector<16x16xf32>
    %10 = vector.broadcast %cst_6 : f32 to vector<16x16xf32>
    %11 = arith.select %8, %9, %10 : vector<16x16xi1>, vector<16x16xf32>
    %c0_7 = arith.constant 0 : index
    %c0_8 = arith.constant 0 : index
    %12 = vector.load %arg3[%c0_7, %c0_8] : memref<1x16xf32, #tpu.memory_space<vmem>>, vector<1x16xf32>
    %13 = vector.broadcast %12 : vector<1x16xf32> to vector<16x16xf32>
    %14 = arith.addf %11, %13 : vector<16x16xf32>
    %c0_9 = arith.constant 0 : index
    %c0_10 = arith.constant 0 : index
    %c0_11 = arith.constant 0 : index
    %15 = vector.load %arg5[%c0_9, %c0_10, %c0_11] : memref<1x32x96xbf16, #tpu.memory_space<vmem>>, vector<1x32x96xbf16>
    %16 = vector.shape_cast %15 : vector<1x32x96xbf16> to vector<32x96xbf16>
    %c0_12 = arith.constant 0 : index
    %c0_13 = arith.constant 0 : index
    %c0_14 = arith.constant 0 : index
    %17 = vector.load %arg6[%c0_12, %c0_13, %c0_14] : memref<1x1x96xf32, #tpu.memory_space<vmem>>, vector<1x1x96xf32>
    %18 = vector.shape_cast %17 : vector<1x1x96xf32> to vector<1x96xf32>
    %c0_15 = arith.constant 0 : index
    %c0_16 = arith.constant 0 : index
    %c0_17 = arith.constant 0 : index
    %19 = vector.load %arg7[%c0_15, %c0_16, %c0_17] : memref<1x32x32xbf16, #tpu.memory_space<vmem>>, vector<1x32x32xbf16>
    %20 = vector.shape_cast %19 : vector<1x32x32xbf16> to vector<32x32xbf16>
    %c0_18 = arith.constant 0 : index
    %c0_19 = arith.constant 0 : index
    %c0_20 = arith.constant 0 : index
    %21 = vector.load %arg8[%c0_18, %c0_19, %c0_20] : memref<1x32x64xbf16, #tpu.memory_space<vmem>>, vector<1x32x64xbf16>
    %22 = vector.shape_cast %21 : vector<1x32x64xbf16> to vector<32x64xbf16>
    %c0_21 = arith.constant 0 : index
    %c0_22 = arith.constant 0 : index
    %c0_23 = arith.constant 0 : index
    %23 = vector.load %arg9[%c0_21, %c0_22, %c0_23] : memref<1x1x64xf32, #tpu.memory_space<vmem>>, vector<1x1x64xf32>
    %24 = vector.shape_cast %23 : vector<1x1x64xf32> to vector<1x64xf32>
    %c0_24 = arith.constant 0 : index
    %c0_25 = arith.constant 0 : index
    %c0_26 = arith.constant 0 : index
    %25 = vector.load %arg10[%c0_24, %c0_25, %c0_26] : memref<1x64x32xbf16, #tpu.memory_space<vmem>>, vector<1x64x32xbf16>
    %26 = vector.shape_cast %25 : vector<1x64x32xbf16> to vector<64x32xbf16>
    %c0_27 = arith.constant 0 : index
    %c0_28 = arith.constant 0 : index
    %c0_29 = arith.constant 0 : index
    %27 = vector.load %arg11[%c0_27, %c0_28, %c0_29] : memref<1x6x32xf32, #tpu.memory_space<vmem>>, vector<1x6x32xf32>
    %28 = vector.shape_cast %27 : vector<1x6x32xf32> to vector<6x32xf32>
    %29 = vector.extract_strided_slice %28 {offsets = [0, 0], sizes = [1, 32], strides = [1, 1]} : vector<6x32xf32> to vector<1x32xf32>
    %30 = vector.extract_strided_slice %28 {offsets = [1, 0], sizes = [1, 32], strides = [1, 1]} : vector<6x32xf32> to vector<1x32xf32>
    %31 = vector.extract_strided_slice %28 {offsets = [2, 0], sizes = [1, 32], strides = [1, 1]} : vector<6x32xf32> to vector<1x32xf32>
    %32 = vector.extract_strided_slice %28 {offsets = [3, 0], sizes = [1, 32], strides = [1, 1]} : vector<6x32xf32> to vector<1x32xf32>
    %33 = vector.extract_strided_slice %28 {offsets = [4, 0], sizes = [1, 32], strides = [1, 1]} : vector<6x32xf32> to vector<1x32xf32>
    %34 = vector.extract_strided_slice %28 {offsets = [5, 0], sizes = [1, 32], strides = [1, 1]} : vector<6x32xf32> to vector<1x32xf32>
    %35 = arith.truncf %3 : vector<16x32xf32> to vector<16x32xbf16>
    %cst_30 = arith.constant dense<0.000000e+00> : vector<16x96xf32>
    %36 = tpu.matmul %35, %16, %cst_30 {dimension_numbers = #tpu.dot_dimension_numbers<[1], [0], [0], [1], [0, 0, 1, 1], [], []>} : vector<16x32xbf16>, vector<32x96xbf16>, vector<16x96xf32> -> vector<16x96xf32>
    %37 = vector.broadcast %18 : vector<1x96xf32> to vector<16x96xf32>
    %38 = arith.addf %36, %37 : vector<16x96xf32>
    %39 = arith.truncf %38 : vector<16x96xf32> to vector<16x96xbf16>
    %cst_31 = arith.constant 0.000000e+00 : f32
    %40 = vector.broadcast %cst_31 : f32 to vector<16x32xf32>
    %41 = vector.extract_strided_slice %39 {offsets = [0, 0], sizes = [16, 8], strides = [1, 1]} : vector<16x96xbf16> to vector<16x8xbf16>
    %42 = vector.extract_strided_slice %39 {offsets = [0, 32], sizes = [16, 8], strides = [1, 1]} : vector<16x96xbf16> to vector<16x8xbf16>
    "tpu.trace_start"() <{level = 10 : i32, message = "qd,kd->qk"}> : () -> ()
    %cst_32 = arith.constant dense<0.000000e+00> : vector<16x16xf32>
    %43 = tpu.matmul %41, %42, %cst_32 {dimension_numbers = #tpu.dot_dimension_numbers<[1], [1], [0], [0], [0, 0, 1, 0], [], []>} : vector<16x8xbf16>, vector<16x8xbf16>, vector<16x16xf32> -> vector<16x16xf32>
    "tpu.trace_stop"() : () -> ()
    %44 = arith.addf %43, %14 : vector<16x16xf32>
    %cst_33 = arith.constant dense<0xFF800000> : vector<16xf32>
    %45 = vector.multi_reduction <maximumf>, %44, %cst_33 [1] : vector<16x16xf32> to vector<16xf32>
    %46 = vector.shape_cast %45 : vector<16xf32> to vector<16x1xf32>
    %47 = vector.broadcast %46 : vector<16x1xf32> to vector<16x16xf32>
    %48 = arith.subf %44, %47 : vector<16x16xf32>
    %49 = math.exp %48 : vector<16x16xf32>
    %cst_34 = arith.constant dense<0.000000e+00> : vector<16xf32>
    %50 = vector.multi_reduction <add>, %49, %cst_34 [1] : vector<16x16xf32> to vector<16xf32>
    %51 = vector.shape_cast %50 : vector<16xf32> to vector<16x1xf32>
    %52 = tpu.reciprocal %51 {approx = true} : vector<16x1xf32> -> vector<16x1xf32>
    %53 = vector.broadcast %52 : vector<16x1xf32> to vector<16x16xf32>
    %54 = arith.mulf %49, %53 : vector<16x16xf32>
    %55 = arith.truncf %54 : vector<16x16xf32> to vector<16x16xbf16>
    %56 = vector.extract_strided_slice %39 {offsets = [0, 64], sizes = [16, 8], strides = [1, 1]} : vector<16x96xbf16> to vector<16x8xbf16>
    %cst_35 = arith.constant dense<0.000000e+00> : vector<16x8xf32>
    %57 = tpu.matmul %55, %56, %cst_35 {dimension_numbers = #tpu.dot_dimension_numbers<[1], [0], [0], [1], [0, 0, 1, 1], [], []>} : vector<16x16xbf16>, vector<16x8xbf16>, vector<16x8xf32> -> vector<16x8xf32>
    %58 = arith.truncf %57 : vector<16x8xf32> to vector<16x8xbf16>
    %59 = vector.extract_strided_slice %20 {offsets = [0, 0], sizes = [8, 32], strides = [1, 1]} : vector<32x32xbf16> to vector<8x32xbf16>
    %cst_36 = arith.constant dense<0.000000e+00> : vector<16x32xf32>
    %60 = tpu.matmul %58, %59, %cst_36 {dimension_numbers = #tpu.dot_dimension_numbers<[1], [0], [0], [1], [0, 0, 1, 1], [], []>} : vector<16x8xbf16>, vector<8x32xbf16>, vector<16x32xf32> -> vector<16x32xf32>
    %61 = arith.addf %40, %60 : vector<16x32xf32>
    %62 = vector.extract_strided_slice %39 {offsets = [0, 8], sizes = [16, 8], strides = [1, 1]} : vector<16x96xbf16> to vector<16x8xbf16>
    %63 = vector.extract_strided_slice %39 {offsets = [0, 40], sizes = [16, 8], strides = [1, 1]} : vector<16x96xbf16> to vector<16x8xbf16>
    "tpu.trace_start"() <{level = 10 : i32, message = "qd,kd->qk"}> : () -> ()
    %cst_37 = arith.constant dense<0.000000e+00> : vector<16x16xf32>
    %64 = tpu.matmul %62, %63, %cst_37 {dimension_numbers = #tpu.dot_dimension_numbers<[1], [1], [0], [0], [0, 0, 1, 0], [], []>} : vector<16x8xbf16>, vector<16x8xbf16>, vector<16x16xf32> -> vector<16x16xf32>
    "tpu.trace_stop"() : () -> ()
    %65 = arith.addf %64, %14 : vector<16x16xf32>
    %cst_38 = arith.constant dense<0xFF800000> : vector<16xf32>
    %66 = vector.multi_reduction <maximumf>, %65, %cst_38 [1] : vector<16x16xf32> to vector<16xf32>
    %67 = vector.shape_cast %66 : vector<16xf32> to vector<16x1xf32>
    %68 = vector.broadcast %67 : vector<16x1xf32> to vector<16x16xf32>
    %69 = arith.subf %65, %68 : vector<16x16xf32>
    %70 = math.exp %69 : vector<16x16xf32>
    %cst_39 = arith.constant dense<0.000000e+00> : vector<16xf32>
    %71 = vector.multi_reduction <add>, %70, %cst_39 [1] : vector<16x16xf32> to vector<16xf32>
    %72 = vector.shape_cast %71 : vector<16xf32> to vector<16x1xf32>
    %73 = tpu.reciprocal %72 {approx = true} : vector<16x1xf32> -> vector<16x1xf32>
    %74 = vector.broadcast %73 : vector<16x1xf32> to vector<16x16xf32>
    %75 = arith.mulf %70, %74 : vector<16x16xf32>
    %76 = arith.truncf %75 : vector<16x16xf32> to vector<16x16xbf16>
    %77 = vector.extract_strided_slice %39 {offsets = [0, 72], sizes = [16, 8], strides = [1, 1]} : vector<16x96xbf16> to vector<16x8xbf16>
    %cst_40 = arith.constant dense<0.000000e+00> : vector<16x8xf32>
    %78 = tpu.matmul %76, %77, %cst_40 {dimension_numbers = #tpu.dot_dimension_numbers<[1], [0], [0], [1], [0, 0, 1, 1], [], []>} : vector<16x16xbf16>, vector<16x8xbf16>, vector<16x8xf32> -> vector<16x8xf32>
    %79 = arith.truncf %78 : vector<16x8xf32> to vector<16x8xbf16>
    %80 = vector.extract_strided_slice %20 {offsets = [8, 0], sizes = [8, 32], strides = [1, 1]} : vector<32x32xbf16> to vector<8x32xbf16>
    %cst_41 = arith.constant dense<0.000000e+00> : vector<16x32xf32>
    %81 = tpu.matmul %79, %80, %cst_41 {dimension_numbers = #tpu.dot_dimension_numbers<[1], [0], [0], [1], [0, 0, 1, 1], [], []>} : vector<16x8xbf16>, vector<8x32xbf16>, vector<16x32xf32> -> vector<16x32xf32>
    %82 = arith.addf %61, %81 : vector<16x32xf32>
    %83 = vector.extract_strided_slice %39 {offsets = [0, 16], sizes = [16, 8], strides = [1, 1]} : vector<16x96xbf16> to vector<16x8xbf16>
    %84 = vector.extract_strided_slice %39 {offsets = [0, 48], sizes = [16, 8], strides = [1, 1]} : vector<16x96xbf16> to vector<16x8xbf16>
    "tpu.trace_start"() <{level = 10 : i32, message = "qd,kd->qk"}> : () -> ()
    %cst_42 = arith.constant dense<0.000000e+00> : vector<16x16xf32>
    %85 = tpu.matmul %83, %84, %cst_42 {dimension_numbers = #tpu.dot_dimension_numbers<[1], [1], [0], [0], [0, 0, 1, 0], [], []>} : vector<16x8xbf16>, vector<16x8xbf16>, vector<16x16xf32> -> vector<16x16xf32>
    "tpu.trace_stop"() : () -> ()
    %86 = arith.addf %85, %14 : vector<16x16xf32>
    %cst_43 = arith.constant dense<0xFF800000> : vector<16xf32>
    %87 = vector.multi_reduction <maximumf>, %86, %cst_43 [1] : vector<16x16xf32> to vector<16xf32>
    %88 = vector.shape_cast %87 : vector<16xf32> to vector<16x1xf32>
    %89 = vector.broadcast %88 : vector<16x1xf32> to vector<16x16xf32>
    %90 = arith.subf %86, %89 : vector<16x16xf32>
    %91 = math.exp %90 : vector<16x16xf32>
    %cst_44 = arith.constant dense<0.000000e+00> : vector<16xf32>
    %92 = vector.multi_reduction <add>, %91, %cst_44 [1] : vector<16x16xf32> to vector<16xf32>
    %93 = vector.shape_cast %92 : vector<16xf32> to vector<16x1xf32>
    %94 = tpu.reciprocal %93 {approx = true} : vector<16x1xf32> -> vector<16x1xf32>
    %95 = vector.broadcast %94 : vector<16x1xf32> to vector<16x16xf32>
    %96 = arith.mulf %91, %95 : vector<16x16xf32>
    %97 = arith.truncf %96 : vector<16x16xf32> to vector<16x16xbf16>
    %98 = vector.extract_strided_slice %39 {offsets = [0, 80], sizes = [16, 8], strides = [1, 1]} : vector<16x96xbf16> to vector<16x8xbf16>
    %cst_45 = arith.constant dense<0.000000e+00> : vector<16x8xf32>
    %99 = tpu.matmul %97, %98, %cst_45 {dimension_numbers = #tpu.dot_dimension_numbers<[1], [0], [0], [1], [0, 0, 1, 1], [], []>} : vector<16x16xbf16>, vector<16x8xbf16>, vector<16x8xf32> -> vector<16x8xf32>
    %100 = arith.truncf %99 : vector<16x8xf32> to vector<16x8xbf16>
    %101 = vector.extract_strided_slice %20 {offsets = [16, 0], sizes = [8, 32], strides = [1, 1]} : vector<32x32xbf16> to vector<8x32xbf16>
    %cst_46 = arith.constant dense<0.000000e+00> : vector<16x32xf32>
    %102 = tpu.matmul %100, %101, %cst_46 {dimension_numbers = #tpu.dot_dimension_numbers<[1], [0], [0], [1], [0, 0, 1, 1], [], []>} : vector<16x8xbf16>, vector<8x32xbf16>, vector<16x32xf32> -> vector<16x32xf32>
    %103 = arith.addf %82, %102 : vector<16x32xf32>
    %104 = vector.extract_strided_slice %39 {offsets = [0, 24], sizes = [16, 8], strides = [1, 1]} : vector<16x96xbf16> to vector<16x8xbf16>
    %105 = vector.extract_strided_slice %39 {offsets = [0, 56], sizes = [16, 8], strides = [1, 1]} : vector<16x96xbf16> to vector<16x8xbf16>
    "tpu.trace_start"() <{level = 10 : i32, message = "qd,kd->qk"}> : () -> ()
    %cst_47 = arith.constant dense<0.000000e+00> : vector<16x16xf32>
    %106 = tpu.matmul %104, %105, %cst_47 {dimension_numbers = #tpu.dot_dimension_numbers<[1], [1], [0], [0], [0, 0, 1, 0], [], []>} : vector<16x8xbf16>, vector<16x8xbf16>, vector<16x16xf32> -> vector<16x16xf32>
    "tpu.trace_stop"() : () -> ()
    %107 = arith.addf %106, %14 : vector<16x16xf32>
    %cst_48 = arith.constant dense<0xFF800000> : vector<16xf32>
    %108 = vector.multi_reduction <maximumf>, %107, %cst_48 [1] : vector<16x16xf32> to vector<16xf32>
    %109 = vector.shape_cast %108 : vector<16xf32> to vector<16x1xf32>
    %110 = vector.broadcast %109 : vector<16x1xf32> to vector<16x16xf32>
    %111 = arith.subf %107, %110 : vector<16x16xf32>
    %112 = math.exp %111 : vector<16x16xf32>
    %cst_49 = arith.constant dense<0.000000e+00> : vector<16xf32>
    %113 = vector.multi_reduction <add>, %112, %cst_49 [1] : vector<16x16xf32> to vector<16xf32>
    %114 = vector.shape_cast %113 : vector<16xf32> to vector<16x1xf32>
    %115 = tpu.reciprocal %114 {approx = true} : vector<16x1xf32> -> vector<16x1xf32>
    %116 = vector.broadcast %115 : vector<16x1xf32> to vector<16x16xf32>
    %117 = arith.mulf %112, %116 : vector<16x16xf32>
    %118 = arith.truncf %117 : vector<16x16xf32> to vector<16x16xbf16>
    %119 = vector.extract_strided_slice %39 {offsets = [0, 88], sizes = [16, 8], strides = [1, 1]} : vector<16x96xbf16> to vector<16x8xbf16>
    %cst_50 = arith.constant dense<0.000000e+00> : vector<16x8xf32>
    %120 = tpu.matmul %118, %119, %cst_50 {dimension_numbers = #tpu.dot_dimension_numbers<[1], [0], [0], [1], [0, 0, 1, 1], [], []>} : vector<16x16xbf16>, vector<16x8xbf16>, vector<16x8xf32> -> vector<16x8xf32>
    %121 = arith.truncf %120 : vector<16x8xf32> to vector<16x8xbf16>
    %122 = vector.extract_strided_slice %20 {offsets = [24, 0], sizes = [8, 32], strides = [1, 1]} : vector<32x32xbf16> to vector<8x32xbf16>
    %cst_51 = arith.constant dense<0.000000e+00> : vector<16x32xf32>
    %123 = tpu.matmul %121, %122, %cst_51 {dimension_numbers = #tpu.dot_dimension_numbers<[1], [0], [0], [1], [0, 0, 1, 1], [], []>} : vector<16x8xbf16>, vector<8x32xbf16>, vector<16x32xf32> -> vector<16x32xf32>
    %124 = arith.addf %103, %123 : vector<16x32xf32>
    %125 = vector.broadcast %29 : vector<1x32xf32> to vector<16x32xf32>
    %126 = arith.addf %124, %125 : vector<16x32xf32>
    %127 = arith.addf %3, %126 : vector<16x32xf32>
    %cst_52 = arith.constant dense<0.000000e+00> : vector<16xf32>
    %128 = vector.multi_reduction <add>, %127, %cst_52 [1] : vector<16x32xf32> to vector<16xf32>
    %129 = vector.shape_cast %128 : vector<16xf32> to vector<16x1xf32>
    %cst_53 = arith.constant 3.200000e+01 : f32
    %130 = vector.broadcast %cst_53 : f32 to vector<16x1xf32>
    %131 = arith.divf %129, %130 : vector<16x1xf32>
    %132 = vector.broadcast %131 : vector<16x1xf32> to vector<16x32xf32>
    %133 = arith.subf %127, %132 : vector<16x32xf32>
    %134 = arith.mulf %133, %133 : vector<16x32xf32>
    %cst_54 = arith.constant dense<0.000000e+00> : vector<16xf32>
    %135 = vector.multi_reduction <add>, %134, %cst_54 [1] : vector<16x32xf32> to vector<16xf32>
    %136 = vector.shape_cast %135 : vector<16xf32> to vector<16x1xf32>
    %cst_55 = arith.constant 3.200000e+01 : f32
    %137 = vector.broadcast %cst_55 : f32 to vector<16x1xf32>
    %138 = arith.divf %136, %137 : vector<16x1xf32>
    %cst_56 = arith.constant 9.99999974E-6 : f32
    %139 = vector.broadcast %cst_56 : f32 to vector<16x1xf32>
    %140 = arith.addf %138, %139 : vector<16x1xf32>
    %141 = math.rsqrt %140 : vector<16x1xf32>
    %142 = vector.broadcast %131 : vector<16x1xf32> to vector<16x32xf32>
    %143 = arith.subf %127, %142 : vector<16x32xf32>
    %144 = vector.broadcast %141 : vector<16x1xf32> to vector<16x32xf32>
    %145 = arith.mulf %143, %144 : vector<16x32xf32>
    %146 = vector.broadcast %31 : vector<1x32xf32> to vector<16x32xf32>
    %147 = arith.mulf %145, %146 : vector<16x32xf32>
    %148 = vector.broadcast %32 : vector<1x32xf32> to vector<16x32xf32>
    %149 = arith.addf %147, %148 : vector<16x32xf32>
    %150 = arith.truncf %149 : vector<16x32xf32> to vector<16x32xbf16>
    %cst_57 = arith.constant dense<0.000000e+00> : vector<16x64xf32>
    %151 = tpu.matmul %150, %22, %cst_57 {dimension_numbers = #tpu.dot_dimension_numbers<[1], [0], [0], [1], [0, 0, 1, 1], [], []>} : vector<16x32xbf16>, vector<32x64xbf16>, vector<16x64xf32> -> vector<16x64xf32>
    %152 = vector.broadcast %24 : vector<1x64xf32> to vector<16x64xf32>
    %153 = arith.addf %151, %152 : vector<16x64xf32>
    %cst_58 = arith.constant 5.000000e-01 : f32
    %154 = vector.broadcast %cst_58 : f32 to vector<16x64xf32>
    %155 = arith.mulf %154, %153 : vector<16x64xf32>
    %cst_59 = arith.constant 0.707106769 : f32
    %156 = vector.broadcast %cst_59 : f32 to vector<16x64xf32>
    %157 = arith.mulf %153, %156 : vector<16x64xf32>
    %cst_60 = arith.constant 0.000000e+00 : f32
    %158 = vector.broadcast %cst_60 : f32 to vector<16x64xf32>
    %159 = arith.cmpf oge, %157, %158 : vector<16x64xf32>
    %cst_61 = arith.constant 1.000000e+00 : f32
    %cst_62 = arith.constant -1.000000e+00 : f32
    %160 = vector.broadcast %cst_61 : f32 to vector<16x64xf32>
    %161 = vector.broadcast %cst_62 : f32 to vector<16x64xf32>
    %162 = arith.select %159, %160, %161 : vector<16x64xi1>, vector<16x64xf32>
    %163 = math.absf %157 : vector<16x64xf32>
    %cst_63 = arith.constant 0.327591091 : f32
    %164 = vector.broadcast %cst_63 : f32 to vector<16x64xf32>
    %165 = arith.mulf %164, %163 : vector<16x64xf32>
    %cst_64 = arith.constant 1.000000e+00 : f32
    %166 = vector.broadcast %cst_64 : f32 to vector<16x64xf32>
    %167 = arith.addf %166, %165 : vector<16x64xf32>
    %cst_65 = arith.constant 1.000000e+00 : f32
    %168 = vector.broadcast %cst_65 : f32 to vector<16x64xf32>
    %169 = arith.divf %168, %167 : vector<16x64xf32>
    %cst_66 = arith.constant 1.06140542 : f32
    %170 = vector.broadcast %cst_66 : f32 to vector<16x64xf32>
    %171 = arith.mulf %170, %169 : vector<16x64xf32>
    %cst_67 = arith.constant -1.45315206 : f32
    %172 = vector.broadcast %cst_67 : f32 to vector<16x64xf32>
    %173 = arith.addf %171, %172 : vector<16x64xf32>
    %174 = arith.mulf %173, %169 : vector<16x64xf32>
    %cst_68 = arith.constant 1.42141378 : f32
    %175 = vector.broadcast %cst_68 : f32 to vector<16x64xf32>
    %176 = arith.addf %174, %175 : vector<16x64xf32>
    %177 = arith.mulf %176, %169 : vector<16x64xf32>
    %cst_69 = arith.constant -0.284496725 : f32
    %178 = vector.broadcast %cst_69 : f32 to vector<16x64xf32>
    %179 = arith.addf %177, %178 : vector<16x64xf32>
    %180 = arith.mulf %179, %169 : vector<16x64xf32>
    %cst_70 = arith.constant 0.254829586 : f32
    %181 = vector.broadcast %cst_70 : f32 to vector<16x64xf32>
    %182 = arith.addf %180, %181 : vector<16x64xf32>
    %183 = arith.mulf %182, %169 : vector<16x64xf32>
    %cst_71 = arith.constant 0.000000e+00 : f32
    %184 = vector.broadcast %cst_71 : f32 to vector<16x64xf32>
    %185 = arith.subf %184, %163 : vector<16x64xf32>
    %186 = arith.mulf %185, %163 : vector<16x64xf32>
    %187 = math.exp %186 : vector<16x64xf32>
    %188 = arith.mulf %183, %187 : vector<16x64xf32>
    %cst_72 = arith.constant 1.000000e+00 : f32
    %189 = vector.broadcast %cst_72 : f32 to vector<16x64xf32>
    %190 = arith.subf %189, %188 : vector<16x64xf32>
    %191 = arith.mulf %162, %190 : vector<16x64xf32>
    %cst_73 = arith.constant 1.000000e+00 : f32
    %192 = vector.broadcast %cst_73 : f32 to vector<16x64xf32>
    %193 = arith.addf %192, %191 : vector<16x64xf32>
    %194 = arith.mulf %155, %193 : vector<16x64xf32>
    %195 = arith.truncf %194 : vector<16x64xf32> to vector<16x64xbf16>
    %cst_74 = arith.constant dense<0.000000e+00> : vector<16x32xf32>
    %196 = tpu.matmul %195, %26, %cst_74 {dimension_numbers = #tpu.dot_dimension_numbers<[1], [0], [0], [1], [0, 0, 1, 1], [], []>} : vector<16x64xbf16>, vector<64x32xbf16>, vector<16x32xf32> -> vector<16x32xf32>
    %197 = vector.broadcast %30 : vector<1x32xf32> to vector<16x32xf32>
    %198 = arith.addf %196, %197 : vector<16x32xf32>
    %199 = arith.addf %149, %198 : vector<16x32xf32>
    %cst_75 = arith.constant dense<0.000000e+00> : vector<16xf32>
    %200 = vector.multi_reduction <add>, %199, %cst_75 [1] : vector<16x32xf32> to vector<16xf32>
    %201 = vector.shape_cast %200 : vector<16xf32> to vector<16x1xf32>
    %cst_76 = arith.constant 3.200000e+01 : f32
    %202 = vector.broadcast %cst_76 : f32 to vector<16x1xf32>
    %203 = arith.divf %201, %202 : vector<16x1xf32>
    %204 = vector.broadcast %203 : vector<16x1xf32> to vector<16x32xf32>
    %205 = arith.subf %199, %204 : vector<16x32xf32>
    %206 = arith.mulf %205, %205 : vector<16x32xf32>
    %cst_77 = arith.constant dense<0.000000e+00> : vector<16xf32>
    %207 = vector.multi_reduction <add>, %206, %cst_77 [1] : vector<16x32xf32> to vector<16xf32>
    %208 = vector.shape_cast %207 : vector<16xf32> to vector<16x1xf32>
    %cst_78 = arith.constant 3.200000e+01 : f32
    %209 = vector.broadcast %cst_78 : f32 to vector<16x1xf32>
    %210 = arith.divf %208, %209 : vector<16x1xf32>
    %cst_79 = arith.constant 9.99999974E-6 : f32
    %211 = vector.broadcast %cst_79 : f32 to vector<16x1xf32>
    %212 = arith.addf %210, %211 : vector<16x1xf32>
    %213 = math.rsqrt %212 : vector<16x1xf32>
    %214 = vector.broadcast %203 : vector<16x1xf32> to vector<16x32xf32>
    %215 = arith.subf %199, %214 : vector<16x32xf32>
    %216 = vector.broadcast %213 : vector<16x1xf32> to vector<16x32xf32>
    %217 = arith.mulf %215, %216 : vector<16x32xf32>
    %218 = vector.broadcast %33 : vector<1x32xf32> to vector<16x32xf32>
    %219 = arith.mulf %217, %218 : vector<16x32xf32>
    %220 = vector.broadcast %34 : vector<1x32xf32> to vector<16x32xf32>
    %221 = arith.addf %219, %220 : vector<16x32xf32>
    %c0_80 = arith.constant 0 : index
    %c0_81 = arith.constant 0 : index
    %222 = vector.load %arg12[%c0_80, %c0_81] : memref<16x32xf32, #tpu.memory_space<vmem>>, vector<16x32xf32>
    tpu.vector_store %arg12[%c0_80, %c0_81], %221 {strides = array<i32>} : memref<16x32xf32, #tpu.memory_space<vmem>>, vector<16x32xf32>,
    return
  }
  func.func @transform_0(%arg0: i32) -> (i32, i32) {
    %c0_i32 = arith.constant 0 : i32
    %c0_i32_0 = arith.constant 0 : i32
    %c0_i32_1 = arith.constant 0 : i32
    return %c0_i32, %c0_i32_0 : i32, i32
  }
  func.func @transform_1(%arg0: i32) -> (i32, i32) {
    %c0_i32 = arith.constant 0 : i32
    %c0_i32_0 = arith.constant 0 : i32
    %c0_i32_1 = arith.constant 0 : i32
    return %c0_i32, %c0_i32_0 : i32, i32
  }
  func.func @transform_2(%arg0: i32) -> (i32, i32) {
    %c0_i32 = arith.constant 0 : i32
    %c0_i32_0 = arith.constant 0 : i32
    %c0_i32_1 = arith.constant 0 : i32
    return %c0_i32, %c0_i32_0 : i32, i32
  }
  func.func @transform_3(%arg0: i32) -> (i32, i32) {
    %c0_i32 = arith.constant 0 : i32
    %c0_i32_0 = arith.constant 0 : i32
    %c0_i32_1 = arith.constant 0 : i32
    return %c0_i32, %c0_i32_0 : i32, i32
  }
  func.func @transform_4(%arg0: i32) -> (i32, i32, i32) {
    %c0_i32 = arith.constant 0 : i32
    %c0_i32_0 = arith.constant 0 : i32
    %c0_i32_1 = arith.constant 0 : i32
    return %arg0, %c0_i32, %c0_i32_0 : i32, i32, i32
  }
  func.func @transform_5(%arg0: i32) -> (i32, i32, i32) {
    %c0_i32 = arith.constant 0 : i32
    %c0_i32_0 = arith.constant 0 : i32
    %c0_i32_1 = arith.constant 0 : i32
    return %arg0, %c0_i32, %c0_i32_0 : i32, i32, i32
  }
  func.func @transform_6(%arg0: i32) -> (i32, i32, i32) {
    %c0_i32 = arith.constant 0 : i32
    %c0_i32_0 = arith.constant 0 : i32
    %c0_i32_1 = arith.constant 0 : i32
    return %arg0, %c0_i32, %c0_i32_0 : i32, i32, i32
  }
  func.func @transform_7(%arg0: i32) -> (i32, i32, i32) {
    %c0_i32 = arith.constant 0 : i32
    %c0_i32_0 = arith.constant 0 : i32
    %c0_i32_1 = arith.constant 0 : i32
    return %arg0, %c0_i32, %c0_i32_0 : i32, i32, i32
  }
  func.func @transform_8(%arg0: i32) -> (i32, i32, i32) {
    %c0_i32 = arith.constant 0 : i32
    %c0_i32_0 = arith.constant 0 : i32
    %c0_i32_1 = arith.constant 0 : i32
    return %arg0, %c0_i32, %c0_i32_0 : i32, i32, i32
  }
  func.func @transform_9(%arg0: i32) -> (i32, i32, i32) {
    %c0_i32 = arith.constant 0 : i32
    %c0_i32_0 = arith.constant 0 : i32
    %c0_i32_1 = arith.constant 0 : i32
    return %arg0, %c0_i32, %c0_i32_0 : i32, i32, i32
  }
  func.func @transform_10(%arg0: i32) -> (i32, i32, i32) {
    %c0_i32 = arith.constant 0 : i32
    %c0_i32_0 = arith.constant 0 : i32
    %c0_i32_1 = arith.constant 0 : i32
    return %arg0, %c0_i32, %c0_i32_0 : i32, i32, i32
  }
  func.func @transform_11(%arg0: i32) -> (i32, i32) {
    %c0_i32 = arith.constant 0 : i32
    %c0_i32_0 = arith.constant 0 : i32
    %c0_i32_1 = arith.constant 0 : i32
    return %c0_i32, %c0_i32_0 : i32, i32
  }
}

</mosaic_0001>

<bundles_post_ra>
// kernel: tpu_custom_call.1
= control target key start
LH: loop header
LB: loop body
LE: loop exit
PB: predicated region body
PF: predicated region fallthrough
CT: control target
= control target key end

     0   :  { %16 = vsyncpa [#allocation3], 0  ;;  %s2078_s17 = smov 0   ;;  %s2354_s0 = inlined_call_operand.vmem [shape: f32[16,1], index: 0, kind: input, shape index: {}]   ;;  %s2355_s1 = inlined_call_operand.vmem [shape: f32[1,16], index: 1, kind: input, shape index: {}]   ;;  %s2356_s2 = inlined_call_operand.vmem [shape: f32[1,16], index: 2, kind: input, shape index: {}]   ;;  %s2357_s3 = inlined_call_operand.vmem [shape: f32[16,32], index: 3, kind: input, shape index: {}]   ;;  %s2358_s4 = inlined_call_operand.vmem [shape: bf16[2,32,96], index: 4, kind: input, shape index: {}]   ;;  %s2359_s5 = inlined_call_operand.vmem [shape: f32[2,1,96], index: 5, kind: input, shape index: {}]   ;;  %s2360_s6 = inlined_call_operand.vmem [shape: bf16[2,32,32], index: 6, kind: input, shape index: {}]   ;;  %s2361_s7 = inlined_call_operand.vmem [shape: bf16[2,32,64], index: 7, kind: input, shape index: {}]   ;;  %s2362_s8 = inlined_call_operand.vmem [shape: f32[2,1,64], index: 8, kind: input, shape index: {}]   ;;  %s2363_s9 = inlined_call_operand.vmem [shape: bf16[2,64,32], index: 9, kind: input, shape index: {}]   ;;  %s2364_s10 = inlined_call_operand.vmem [shape: f32[2,6,32], index: 10, kind: input, shape index: {}]   ;;  %s2365_s11 = inlined_call_operand.hbm [shape: f32[16,32], index: 11, kind: output, shape index: {}]  }
   0x1 LB: > { %2367 = sst [smem:[#allocation5_spill]] %s1997_s17  ;;  %s2084_s18 = sadd.s32 4294967295, %s1997_s17   ;;  %s1997_s17 = sphi %s2078_s17, %s22_s17  }
   0x2   : > { %p1689_p0 = scmp.ge.s32.totalorder %s1997_s17, 1  ;;  %p388_p1 = scmp.lt.s32.totalorder %s1997_s17, 3 }
   0x4   : > { %p389_p2 = pnand %p1689_p0, %p388_p1 }
   0x5   : > { %p448_p3 = scmp.lt.s32.totalorder (!%p389_p2), %s2084_s18, 1  ;;  %p1699_p4 = scmp.ne.s32.totalorder (!%p389_p2), %s2084_s18, 0 }
   0x6   : > { %392 = sbr.rel (%p389_p2) target bundleno = 3776 (0xec0), region = 64 }
   0xd   : > { %s2090_s19 = scalar_select %p448_p3, %s2084_s18, 1 }
   0xe   : > { %482 = sbr.rel (%p1699_p4) target bundleno = 21 (0x15), region = 68  ;;  %v483_v0 = vld [vmem:[%s2357_s3] sm:$0xff] (!%p1699_p4)  ;;  %vm485_vm0 = vcmask (!%p1699_p4), 261120   ;;  %v484_v1 = vld [vmem:[%s2357_s3 + $0x8] sm:$0xff] (!%p1699_p4) }
   0xf   : > { %s1731_s20 = sshll.u32 %s2090_s19, 4  ;;  %s468_s16 = scalar_lea.vmem %s2362_s8, %s2090_s19  ;;  %486 = vst.msk [vmem:[#allocation2] sm:$0xff] (!%p1699_p4), %vm485_vm0, %v483_v0  ;;  %487 = vst.msk [vmem:[#allocation2 + $0x8] sm:$0xff] (!%p1699_p4), %vm485_vm0, %v484_v1 }
  0x10   : > { %s452_s26 = scalar_lea.vmem %s2358_s4, %s1731_s20  ;;  %s2103_s29 = scalar_lea.vmem %s2360_s6, %s1731_s20 }
  0x11   : > { %s2108_s13 = scalar_lea.vmem %s2361_s7, %s1731_s20  ;;  %s1734_s21 = sshll.u32 %s2090_s19, 5 }
  0x12   : > { %s1698_s22 = sshll.u32 %s2090_s19, 3  ;;  %s2119_s24 = scalar_lea.vmem %s2363_s9, %s1734_s21 }
  0x13   : > { %s2124_s28 = scalar_lea.vmem %s2364_s10, %s1698_s22 }
  0x15 PF: > { %v1905_v2 = vld [vmem:[%s452_s26] sm:$0xff]   ;;  %v1999_v3 = vmov 0.0   ;;  %v1906_v4 = vld [vmem:[%s452_s26 + $0x8] sm:$0xff]   ;;  %vm2000_vm1 = vmmov 0   ;;  %vm564_vm2 = vcmask 261120   ;;  %s2368_s26 = scalar_lea.vmem %s2359_s5, %s2090_s19  ;;  %s2001_s15 = smov 120  }
  0x16   : > { %1770 = vmatprep.subr.bf16.mxu1 %v1999_v3  ;;  %1784 = vmatprep.subr.bf16.mxu0 %v1999_v3  ;;  %v2137_v5 = vld [vmem:[#allocation2] sm:$0xff]  ;;  %v2139_v6 = vld [vmem:[#allocation2 + $0x8] sm:$0xff]  ;;  %v1702_v8 = vld [vmem:[%s2368_s26] ss:$0 sm:$0xff]  ;;  %s2002_s21 = smov 96   ;;  %s2003_s27 = smov 88  }
  0x17   : > { %1771 = vmatpush3.bf16.msra.mxu1 %v1905_v2  ;;  %1774 = vmatprep.mubr.msk.bf16.mxu1 %vm2000_vm1, %v1999_v3  ;;  %v545_v7 = vpack.c.bf16 %v2139_v6, %v2137_v5  ;;  %v490_v16 = vld [vmem:[%s2354_s0] sm:$0xff]  ;;  %v2004_v17 = vmov 0   ;;  %v491_v18 = vld [vmem:[%s2354_s0 + $0x8] sm:$0xff]  ;;  %vm613_vm3 = vcmask 64512   ;;  %v2005_v28 = vmov -1e+30  }
  0x18   : > { %1772 = vmatprep.subr.bf16.mxu1 %v1999_v3  ;;  %1786 = vmatprep.mubr.msk.bf16.mxu0 %vm2000_vm1, %v1999_v3  ;;  %v1700_v24 = vld [vmem:[%s2355_s1] ss:$0 sm:$0xff]  ;;  %vm661_vm6 = vcmask 130048   ;;  %s2006_s26 = smov 64   ;;  %s2009_s22 = smov 112   ;;  %vm858_vm7 = vcmask 1043456  }
  0x19   : > { %1903 = vset.pattern.permute.xlu1 %v2004_v17  ;;  %1904 = vset.pattern.permute.xlu0 %v2004_v17  ;;  %v1701_v27 = vld [vmem:[%s2356_s2] ss:$0 sm:$0xff]  ;;  %s2010_s25 = smov 48   ;;  %s2012_s20 = smov 72   ;;  %vm1485_vm10 = vcmask 523264  }
  0x1a   : > { %s2013_s30 = smov 40   ;;  %s2015_s19 = smov [#allocation2]  }
  0x1b   : > { %1773 = vmatpush3.bf16.msra.mxu1 %v1906_v4  ;;  %p1874_p5 = scmp.eq.s32.totalorder %s2084_s18, 1 }
  0x1c   : > { %1778 = vmatprep.subr.bf16.mxu1 %v1999_v3 }
  0x1e   : > { %1775 = vmatmul.mubr.msk.bf16.vlgmr.msra.gmra.mrb[0].mxu1 %vm564_vm2, %v545_v7 }
  0x1f   : > { %1780 = vmatprep.mubr.msk.bf16.mxu1 %vm2000_vm1, %v1999_v3 }
  0xf1   : > { %v602_v9 = vpop.f32.mrb[0].mxu1 }
  0xf2   : > { %v1776_v10 = vpop.f32.mrb[1].mxu1  ;;  %v603_v12 = vadd.f32 %v1702_v8, %v602_v9 }
  0xf3   : > { %v605_v11 = vpop.f32.mrb[2].mxu1 }
  0xf4   : > { %v606_v13 = vadd.f32 %v1702_v8, %v605_v11  ;;  %v1777_v14 = vpop.f32.mrb[3].mxu1 }
  0xf6   : > { %v2155_v15 = vpack.c.bf16 %v606_v13, %v603_v12 }
  0xf8   : > { %733 = vrot.lane.b32.xlu1 %v2155_v15, %s2001_s15  ;;  %611 = vrot.lane.b32.xlu0 %v2155_v15, %s2002_s21  ;;  %s2007_s15 = smov 80   ;;  %s2008_s21 = smov 56  }
  0xfc   : > { %735 = vrot.lane.b32.xlu0 %v2155_v15, %s2003_s27  ;;  %495 = vperm.xlu1 %1903, %v490_v16   ;;  %s2011_s27 = smov 104  }
 0x100   : > { %500 = vperm.xlu0 %1904, %v491_v18  }
 0x16a   : > { %v612_v19 = vpop.permute.xlu0 %611  ;;  %v734_v23 = vpop.permute.xlu1 %733 }
 0x16b   : > { %v618_v20 = vsel %vm613_vm3, %v612_v19, 0 }
 0x16c   : > { %1779 = vmatpush3.bf16.xpose.msra.mxu1 %v618_v20 }
 0x16d   : > { %1790 = vmatprep.subr.bf16.mxu1 %v1999_v3 }
 0x16e   : > { %v736_v21 = vpop.permute.xlu0 %735 }
 0x16f   : > { %v741_v22 = vsel %vm613_vm3, %v736_v21, 0 }
 0x173   : > { %1781 = vmatmul.mubr.msk.bf16.vlgmr.msra.gmra.mrb[4].mxu1 %vm613_vm3, %v2155_v15 }
 0x174   : > { %1791 = vmatpush3.bf16.xpose.msra.mxu1 %v741_v22  ;;  %1792 = vmatprep.mubr.msk.bf16.mxu1 %vm2000_vm1, %v1999_v3 }
 0x175   : > { %1802 = vmatprep.subr.bf16.mxu1 %v1999_v3 }
 0x17b   : > { %1793 = vmatmul.mubr.msk.bf16.vlgmr.msra.gmra.mrb[8].mxu1 %vm613_vm3, %v734_v23  ;;  %v496_v25 = vpop.permute.xlu1 %495 }
 0x17c   : > { %1804 = vmatprep.mubr.msk.bf16.mxu1 %vm2000_vm1, %v1999_v3  ;;  %vm509_vm4 = vcmp.eq.f32.partialorder %v496_v25, %v1700_v24  ;;  %v527_v25 = vld [vmem:[%s2103_s29] sm:$0xf] }
 0x17d   : > { %v511_v29 = vsel %vm509_vm4, 0.0, %v2005_v28 }
 0x17e   : > { %v2183_v31 = vadd.f32 %v1701_v27, %v511_v29 }
 0x17f   : > { %v501_v26 = vpop.permute.xlu0 %500 }
 0x180   : > { %vm510_vm5 = vcmp.eq.f32.partialorder %v501_v26, %v1700_v24  ;;  %v907_v26 = vsel %vm858_vm7, %v527_v25, 0 }
 0x181   : > { %v512_v30 = vsel %vm510_vm5, 0.0, %v2005_v28 }
 0x182   : > { %v2185_v32 = vadd.f32 %v1701_v27, %v512_v30  ;;  %v528_v27 = vld [vmem:[%s2103_s29 + $0x4] sm:$0xf] }
 0x183   : > { %v860_v28 = vsel %vm858_vm7, %v528_v27, 0 }
 0x184   : > { %1803 = vmatpush3.bf16.msra.mxu1 %v860_v28 }
 0x185   : > { %1814 = vmatprep.subr.bf16.mxu1 %v1999_v3 }
 0x246   : > { %v654_v33 = vpop.f32.mrb[4].mxu1 }
 0x247   : > { %v655_v34 = vadd.f32 %v654_v33, %v2183_v31  ;;  %v1782_v35 = vpop.f32.mrb[5].mxu1 }
 0x248   : > { %v657_v36 = vpop.f32.mrb[6].mxu1 }
 0x249   : > { %v658_v37 = vadd.f32 %v657_v36, %v2185_v32  ;;  %v1783_v38 = vpop.f32.mrb[7].mxu1  ;;  %v662_v39 = vsel %vm661_vm6, %v655_v34, -inf }
 0x24a   : > { %663 = vmax.xlane.f32.xlu1 %v662_v39 }
 0x24b   : > { %v665_v40 = vsel %vm661_vm6, %v658_v37, -inf }
 0x24c   : > { %666 = vmax.xlane.f32.xlu0 %v665_v40 }
 0x24e   : > { %v777_v41 = vpop.f32.mrb[8].mxu1 }
 0x24f   : > { %v778_v42 = vadd.f32 %v777_v41, %v2183_v31  ;;  %v1794_v43 = vpop.f32.mrb[9].mxu1 }
 0x250   : > { %v780_v44 = vpop.f32.mrb[10].mxu1 }
 0x251   : > { %v781_v45 = vadd.f32 %v780_v44, %v2185_v32  ;;  %v1795_v46 = vpop.f32.mrb[11].mxu1  ;;  %v784_v47 = vsel %vm661_vm6, %v778_v42, -inf }
 0x252   : > { %785 = vmax.xlane.f32.xlu1 %v784_v47 }
 0x253   : > { %v787_v48 = vsel %vm661_vm6, %v781_v45, -inf }
 0x254   : > { %788 = vmax.xlane.f32.xlu0 %v787_v48 }
 0x2d7   : > { %v664_v49 = vpop.xlane.xlu1 %663 }
 0x2d8   : > { %v668_v50 = vsub.f32 %v655_v34, %v664_v49 }
 0x2d9   : > { %v667_v51 = vpop.xlane.xlu0 %666 }
 0x2da   : > { %v670_v52 = vmul.f32 1.442695, %v668_v50  ;;  %v669_v53 = vsub.f32 %v658_v37, %v667_v51 }
 0x2dc   : > { %1913 = vpow2.f32 %v670_v52  ;;  %v672_v54 = vmul.f32 1.442695, %v669_v53 }
 0x2de   : > { %1915 = vpow2.f32 %v672_v54 }
 0x2df   : > { %v786_v55 = vpop.xlane.xlu1 %785 }
 0x2e0   : > { %v790_v56 = vsub.f32 %v778_v42, %v786_v55 }
 0x2e1   : > { %v789_v57 = vpop.xlane.xlu0 %788 }
 0x2e2   : > { %v792_v58 = vmul.f32 1.442695, %v790_v56  ;;  %v791_v59 = vsub.f32 %v781_v45, %v789_v57 }
 0x2e4   : > { %1917 = vpow2.f32 %v792_v58  ;;  %v794_v60 = vmul.f32 1.442695, %v791_v59 }
 0x2e6   : > { %v1914_v61 = vpop.eup %1913  ;;  %1919 = vpow2.f32 %v794_v60 }
 0x2e7   : > { %v674_v62 = vsel %vm661_vm6, %v1914_v61, 0.0 }
 0x2e8   : > { %v1916_v63 = vpop.eup %1915  ;;  %675 = vadd.xlane.f32.xlu1 %v674_v62 }
 0x2e9   : > { %v677_v0 = vsel %vm661_vm6, %v1916_v63, 0.0 }
 0x2ea   : > { %678 = vadd.xlane.f32.xlu0 %v677_v0 }
 0x2ee   : > { %v1918_v1 = vpop.eup %1917 }
 0x2ef   : > { %v796_v2 = vsel %vm661_vm6, %v1918_v1, 0.0 }
 0x2f0   : > { %v1920_v4 = vpop.eup %1919  ;;  %797 = vadd.xlane.f32.xlu1 %v796_v2 }
 0x2f1   : > { %v799_v7 = vsel %vm661_vm6, %v1920_v4, 0.0 }
 0x2f2   : > { %800 = vadd.xlane.f32.xlu0 %v799_v7 }
 0x301   : > { %685 = vrot.lane.b32.xlu1 %v2155_v15, %s2006_s26 }
 0x305   : > { %952 = vrot.lane.b32.xlu1 %v2155_v15, %s2007_s15 }
 0x308   : > { %807 = vrot.lane.b32.xlu0 %v2155_v15, %s2008_s21 }
 0x309   : > { %950 = vrot.lane.b32.xlu1 %v2155_v15, %s2009_s22 }
 0x375   : > { %v676_v8 = vpop.xlane.xlu1 %675 }
 0x376   : > { %1921 = vrcp.f32 %v676_v8 }
 0x377   : > { %v679_v9 = vpop.xlane.xlu0 %678 }
 0x378   : > { %1923 = vrcp.f32 %v679_v9 }
 0x37d   : > { %v798_v10 = vpop.xlane.xlu1 %797 }
 0x37e   : > { %1925 = vrcp.f32 %v798_v10 }
 0x37f   : > { %v801_v11 = vpop.xlane.xlu0 %800 }
 0x380   : > { %v1922_v12 = vpop.eup %1921  ;;  %1927 = vrcp.f32 %v801_v11 }
 0x381   : > { %v686_v13 = vpop.permute.xlu1 %685  ;;  %v682_v16 = vmul.f32 %v1922_v12, %v1914_v61 }
 0x382   : > { %v1924_v14 = vpop.eup %1923  ;;  %1785 = vmatpush3.bf16.msra.mxu0 %v686_v13 }
 0x383   : > { %1796 = vmatprep.subr.bf16.mxu0 %v1999_v3  ;;  %v683_v17 = vmul.f32 %v1924_v14, %v1916_v63  ;;  %v808_v19 = vpop.permute.xlu0 %807 }
 0x385   : > { %v684_v18 = vpack.c.bf16 %v683_v17, %v682_v16  ;;  %v953_v38 = vpop.permute.xlu1 %952 }
 0x386   : > { %v958_v42 = vsel %vm613_vm3, %v953_v38, 0 }
 0x387   : > { %1787 = vmatmul.mubr.msk.bf16.vlgmr.msra.gmra.mrb[0].mxu0 %vm661_vm6, %v684_v18 }
 0x388   : > { %v1926_v20 = vpop.eup %1925  ;;  %1797 = vmatpush3.bf16.msra.mxu0 %v808_v19  ;;  %1798 = vmatprep.mubr.msk.bf16.mxu0 %vm2000_vm1, %v1999_v3 }
 0x389   : > { %1808 = vmatprep.subr.bf16.mxu0 %v1999_v3  ;;  %v804_v22 = vmul.f32 %v1926_v20, %v1918_v1  ;;  %v951_v43 = vpop.permute.xlu1 %950 }
 0x38a   : > { %v1928_v21 = vpop.eup %1927 }
 0x38b   : > { %v805_v23 = vmul.f32 %v1928_v21, %v1920_v4 }
 0x38d   : > { %v806_v24 = vpack.c.bf16 %v805_v23, %v804_v22  ;;  %v529_v23 = vld [vmem:[%s2103_s29 + $0x8] sm:$0xf] }
 0x38f   : > { %1799 = vmatmul.mubr.msk.bf16.vlgmr.msra.gmra.mrb[4].mxu0 %vm661_vm6, %v806_v24  ;;  %v1076_v24 = vsel %vm858_vm7, %v529_v23, 0 }
 0x390   : > { %1810 = vmatprep.mubr.msk.bf16.mxu0 %vm2000_vm1, %v1999_v3  ;;  %1809 = vmatpush3.bf16.msra.mxu0 %v907_v26 }
 0x391   : > { %1820 = vmatprep.subr.bf16.mxu0 %v1999_v3 }
 0x45a   : > { %v725_v29 = vpop.f32.mrb[0].mxu0 }
 0x45b   : > { %v1788_v30 = vpop.f32.mrb[1].mxu0 }
 0x45c   : > { %v728_v33 = vpop.f32.mrb[2].mxu0 }
 0x45d   : > { %v732_v34 = vpack.c.bf16 %v728_v33, %v725_v29  ;;  %v1789_v35 = vpop.f32.mrb[3].mxu0 }
 0x45f   : > { %1811 = vmatmul.mubr.msk.bf16.vlgmr.msra.gmra.mrb[8].mxu0 %vm613_vm3, %v732_v34 }
 0x460   : > { %1822 = vmatprep.mubr.msk.bf16.mxu0 %vm2000_vm1, %v1999_v3 }
 0x462   : > { %v847_v36 = vpop.f32.mrb[4].mxu0 }
 0x463   : > { %v1800_v37 = vpop.f32.mrb[5].mxu0 }
 0x464   : > { %v850_v39 = vpop.f32.mrb[6].mxu0 }
 0x465   : > { %v854_v40 = vpack.c.bf16 %v850_v39, %v847_v36  ;;  %v1801_v41 = vpop.f32.mrb[7].mxu0 }
 0x467   : > { %1805 = vmatmul.mubr.msk.bf16.vlgmr.msra.gmra.mrb[12].mxu1 %vm613_vm3, %v854_v40 }
 0x468   : > { %1815 = vmatpush3.bf16.xpose.msra.mxu1 %v958_v42  ;;  %1816 = vmatprep.mubr.msk.bf16.mxu1 %vm2000_vm1, %v1999_v3 }
 0x469   : > { %1826 = vmatprep.subr.bf16.mxu1 %v1999_v3 }
 0x46f   : > { %1817 = vmatmul.mubr.msk.bf16.vlgmr.msra.gmra.mrb[16].mxu1 %vm613_vm3, %v951_v43 }
 0x470   : > { %1828 = vmatprep.mubr.msk.bf16.mxu1 %vm2000_vm1, %v1999_v3  ;;  %1827 = vmatpush3.bf16.msra.mxu1 %v1076_v24 }
 0x471   : > { %1838 = vmatprep.subr.bf16.mxu1 %v1999_v3 }
 0x532   : > { %v943_v44 = vpop.f32.mrb[8].mxu0 }
 0x533   : > { %v1812_v45 = vpop.f32.mrb[9].mxu0 }
 0x534   : > { %v946_v46 = vpop.f32.mrb[10].mxu0 }
 0x535   : > { %v1813_v47 = vpop.f32.mrb[11].mxu0 }
 0x53a   : > { %v896_v48 = vpop.f32.mrb[12].mxu1 }
 0x53b   : > { %v2228_v49 = vadd.f32 %v943_v44, %v896_v48  ;;  %v1806_v50 = vpop.f32.mrb[13].mxu1  ;;  %v530_v48 = vld [vmem:[%s2103_s29 + $0xc] sm:$0xf] }
 0x53c   : > { %v899_v51 = vpop.f32.mrb[14].mxu1  ;;  %v1247_v50 = vsel %vm858_vm7, %v530_v48, 0 }
 0x53d   : > { %v2230_v52 = vadd.f32 %v946_v46, %v899_v51  ;;  %v1807_v53 = vpop.f32.mrb[15].mxu1 }
 0x542   : > { %v994_v54 = vpop.f32.mrb[16].mxu1 }
 0x543   : > { %v995_v55 = vadd.f32 %v994_v54, %v2183_v31  ;;  %v1818_v56 = vpop.f32.mrb[17].mxu1 }
 0x544   : > { %v997_v57 = vpop.f32.mrb[18].mxu1 }
 0x545   : > { %v998_v58 = vadd.f32 %v997_v57, %v2185_v32  ;;  %v1819_v59 = vpop.f32.mrb[19].mxu1  ;;  %v1001_v60 = vsel %vm661_vm6, %v995_v55, -inf }
 0x546   : > { %1002 = vmax.xlane.f32.xlu0 %v1001_v60 }
 0x547   : > { %v1004_v61 = vsel %vm661_vm6, %v998_v58, -inf }
 0x548   : > { %1005 = vmax.xlane.f32.xlu1 %v1004_v61 }
 0x559   : > { %1024 = vrot.lane.b32.xlu1 %v2155_v15, %s2010_s25 }
 0x55d   : > { %1121 = vrot.lane.b32.xlu1 %v2155_v15, %s2011_s27 }
 0x5d3   : > { %v1003_v62 = vpop.xlane.xlu0 %1002 }
 0x5d4   : > { %v1007_v63 = vsub.f32 %v995_v55, %v1003_v62 }
 0x5d5   : > { %v1006_v0 = vpop.xlane.xlu1 %1005 }
 0x5d6   : > { %v1009_v1 = vmul.f32 1.442695, %v1007_v63  ;;  %v1008_v2 = vsub.f32 %v998_v58, %v1006_v0 }
 0x5d8   : > { %1929 = vpow2.f32 %v1009_v1  ;;  %v1011_v4 = vmul.f32 1.442695, %v1008_v2 }
 0x5d9   : > { %v1025_v7 = vpop.permute.xlu1 %1024 }
 0x5da   : > { %1931 = vpow2.f32 %v1011_v4  ;;  %1821 = vmatpush3.bf16.msra.mxu0 %v1025_v7  ;;  %v1292_v7 = vlaneseq }
 0x5db   : > { %1832 = vmatprep.subr.bf16.mxu0 %v1999_v3 }
 0x5dd   : > { %v1122_v22 = vpop.permute.xlu1 %1121 }
 0x5e2   : > { %v1930_v8 = vpop.eup %1929 }
 0x5e3   : > { %v1013_v9 = vsel %vm661_vm6, %v1930_v8, 0.0 }
 0x5e4   : > { %v1932_v10 = vpop.eup %1931  ;;  %1014 = vadd.xlane.f32.xlu0 %v1013_v9 }
 0x5e5   : > { %v1016_v11 = vsel %vm661_vm6, %v1932_v10, 0.0 }
 0x5e8   : > { %1017 = vadd.xlane.f32.xlu0 %v1016_v11 }
 0x5fe   : > { %1123 = vrot.lane.b32.xlu0 %v2155_v15, %s2012_s20 }
 0x671   : > { %v1015_v12 = vpop.xlane.xlu0 %1014 }
 0x672   : > { %1933 = vrcp.f32 %v1015_v12 }
 0x675   : > { %v1018_v13 = vpop.xlane.xlu0 %1017 }
 0x676   : > { %1935 = vrcp.f32 %v1018_v13 }
 0x679   : > { %v1124_v19 = vpop.permute.xlu0 %1123 }
 0x67a   : > { %v1129_v21 = vsel %vm613_vm3, %v1124_v19, 0 }
 0x67c   : > { %v1934_v14 = vpop.eup %1933 }
 0x67d   : > { %v1021_v17 = vmul.f32 %v1934_v14, %v1930_v8  ;;  %v2275_v8 = vshrl.u32 %v1292_v7, 7 }
 0x67f   : > { %v1294_v9 = vsub.s32 0, %v2275_v8 }
 0x680   : > { %v1936_v16 = vpop.eup %1935 }
 0x681   : > { %v1022_v18 = vmul.f32 %v1936_v16, %v1932_v10  ;;  %v2279_v10 = vld [vmem:[%s2124_s28] sm:$0x3f] }
 0x682   : > { %v1295_v11 = vrot.slane %v2279_v10, %v1294_v9 }
 0x683   : > { %v1023_v20 = vpack.c.bf16 %v1022_v18, %v1021_v17 }
 0x685   : > { %1823 = vmatmul.mubr.msk.bf16.vlgmr.msra.gmra.mrb[12].mxu0 %vm661_vm6, %v1023_v20 }
 0x686   : > { %1833 = vmatpush3.bf16.xpose.msra.mxu0 %v1129_v21  ;;  %1834 = vmatprep.mubr.msk.bf16.mxu0 %vm2000_vm1, %v1999_v3 }
 0x687   : > { %1844 = vmatprep.subr.bf16.mxu0 %v1999_v3 }
 0x68d   : > { %1835 = vmatmul.mubr.msk.bf16.vlgmr.msra.gmra.mrb[16].mxu0 %vm613_vm3, %v1122_v22 }
 0x68e   : > { %1846 = vmatprep.mubr.msk.bf16.mxu0 %vm2000_vm1, %v1999_v3  ;;  %1845 = vmatpush3.bf16.msra.mxu0 %v1247_v50 }
 0x68f   : > { %1858 = vmatprep.subr.bf16.mxu0 %v1999_v3 }
 0x758   : > { %v1064_v25 = vpop.f32.mrb[12].mxu0 }
 0x759   : > { %v1824_v26 = vpop.f32.mrb[13].mxu0 }
 0x75a   : > { %v1067_v27 = vpop.f32.mrb[14].mxu0 }
 0x75b   : > { %v1071_v28 = vpack.c.bf16 %v1067_v27, %v1064_v25  ;;  %v1825_v29 = vpop.f32.mrb[15].mxu0 }
 0x75d   : > { %1829 = vmatmul.mubr.msk.bf16.vlgmr.msra.gmra.mrb[20].mxu1 %vm613_vm3, %v1071_v28 }
 0x75e   : > { %1840 = vmatprep.mubr.msk.bf16.mxu1 %vm2000_vm1, %v1999_v3 }
 0x760   : > { %v1165_v30 = vpop.f32.mrb[16].mxu0 }
 0x761   : > { %v1166_v33 = vadd.f32 %v1165_v30, %v2183_v31  ;;  %v1836_v34 = vpop.f32.mrb[17].mxu0 }
 0x762   : > { %v1168_v35 = vpop.f32.mrb[18].mxu0 }
 0x763   : > { %v1169_v36 = vadd.f32 %v1168_v35, %v2185_v32  ;;  %v1837_v37 = vpop.f32.mrb[19].mxu0  ;;  %v1172_v38 = vsel %vm661_vm6, %v1166_v33, -inf }
 0x764   : > { %1173 = vmax.xlane.f32.xlu1 %v1172_v38 }
 0x765   : > { %v1175_v39 = vsel %vm661_vm6, %v1169_v36, -inf }
 0x766   : > { %1176 = vmax.xlane.f32.xlu0 %v1175_v39 }
 0x7f1   : > { %v1174_v40 = vpop.xlane.xlu1 %1173 }
 0x7f2   : > { %v1178_v41 = vsub.f32 %v1166_v33, %v1174_v40 }
 0x7f3   : > { %v1177_v42 = vpop.xlane.xlu0 %1176 }
 0x7f4   : > { %v1180_v43 = vmul.f32 1.442695, %v1178_v41  ;;  %v1179_v44 = vsub.f32 %v1169_v36, %v1177_v42  ;;  %v1908_v36 = vld [vmem:[%s2108_s13 + $0x8] sm:$0xff]  }
 0x7f6   : > { %1937 = vpow2.f32 %v1180_v43  ;;  %v1182_v45 = vmul.f32 1.442695, %v1179_v44  ;;  %v1329_v43 = vsub.s32 2, %v2275_v8 }
 0x7f8   : > { %1939 = vpow2.f32 %v1182_v45  ;;  %v1330_v45 = vrot.slane %v2279_v10, %v1329_v43  ;;  %v2014_v43 = vmov -1.0  }
 0x800   : > { %v1938_v31 = vpop.eup %1937 }
 0x801   : > { %v1184_v46 = vsel %vm661_vm6, %v1938_v31, 0.0 }
 0x802   : > { %v1940_v32 = vpop.eup %1939  ;;  %1185 = vadd.xlane.f32.xlu0 %v1184_v46  ;;  %v1335_v46 = vsub.s32 3, %v2275_v8 }
 0x803   : > { %v1187_v47 = vsel %vm661_vm6, %v1940_v32, 0.0 }
 0x804   : > { %1188 = vadd.xlane.f32.xlu1 %v1187_v47  ;;  %v1336_v50 = vrot.slane %v2279_v10, %v1335_v46 }
 0x818   : > { %1195 = vrot.lane.b32.xlu0 %v2155_v15, %s2013_s30 }
 0x830   : > { %v1112_v51 = vpop.f32.mrb[20].mxu1 }
 0x831   : > { %v1119_v53 = vadd.f32 %v1112_v51, %v2228_v49  ;;  %v1830_v54 = vpop.f32.mrb[21].mxu1 }
 0x832   : > { %v1115_v55 = vpop.f32.mrb[22].mxu1 }
 0x833   : > { %v1120_v56 = vadd.f32 %v1115_v55, %v2230_v52  ;;  %v1831_v57 = vpop.f32.mrb[23].mxu1 }
 0x834   : > { %v1910_v57 = vld [vmem:[%s2119_s24 + $0x8] sm:$0xff]  }
 0x88f   : > { %v1186_v58 = vpop.xlane.xlu0 %1185 }
 0x890   : > { %1941 = vrcp.f32 %v1186_v58  ;;  %v1911_v58 = vld [vmem:[%s2119_s24 + $0x10] sm:$0xff]  }
 0x891   : > { %v1189_v59 = vpop.xlane.xlu1 %1188 }
 0x892   : > { %1943 = vrcp.f32 %v1189_v59  ;;  %v1912_v59 = vld [vmem:[%s2119_s24 + $0x18] sm:$0xff]  }
 0x893   : > { %v1196_v60 = vpop.permute.xlu0 %1195 }
 0x894   : > { %1839 = vmatpush3.bf16.msra.mxu1 %v1196_v60  ;;  %v1718_v60 = vld [vmem:[%s468_s16] ss:$0 sm:$0xff]  ;;  %s1578_s16 = sshll.u32 %s2015_s19, 4  ;;  %s1579_s16 = int_to_ptr.vmem [resolvable:$true] %s1578_s16 }
 0x895   : > { %1850 = vmatprep.subr.bf16.mxu1 %v1999_v3  ;;  %p1968_p9 = scmp.lt.s32.totalorder %s1579_s16, %s1579_s16 }
 0x89a   : > { %v1942_v15 = vpop.eup %1941 }
 0x89b   : > { %v1192_v62 = vmul.f32 %v1942_v15, %v1938_v31 }
 0x89c   : > { %v1944_v61 = vpop.eup %1943 }
 0x89d   : > { %v1193_v63 = vmul.f32 %v1944_v61, %v1940_v32 }
 0x89f   : > { %v1194_v0 = vpack.c.bf16 %v1193_v63, %v1192_v62 }
 0x8a1   : > { %1841 = vmatmul.mubr.msk.bf16.vlgmr.msra.gmra.mrb[24].mxu1 %vm661_vm6, %v1194_v0 }
 0x8a2   : > { %1854 = vmatprep.mubr.msk.bf16.mxu1 %vm2000_vm1, %v1999_v3 }
 0x974   : > { %v1235_v49 = vpop.f32.mrb[24].mxu1 }
 0x975   : > { %v1842_v52 = vpop.f32.mrb[25].mxu1 }
 0x976   : > { %v1238_v1 = vpop.f32.mrb[26].mxu1 }
 0x977   : > { %v1242_v2 = vpack.c.bf16 %v1238_v1, %v1235_v49  ;;  %v1843_v4 = vpop.f32.mrb[27].mxu1 }
 0x979   : > { %1847 = vmatmul.mubr.msk.bf16.vlgmr.msra.gmra.mrb[20].mxu0 %vm613_vm3, %v1242_v2 }
 0x97a   : > { %1866 = vmatprep.mubr.msk.bf16.mxu0 %vm2000_vm1, %v1999_v3 }
 0xa4c   : > { %v1283_v12 = vpop.f32.mrb[20].mxu0 }
 0xa4d   : > { %v1290_v13 = vadd.f32 %v1283_v12, %v1119_v53  ;;  %v1848_v14 = vpop.f32.mrb[21].mxu0 }
 0xa4e   : > { %v1286_v16 = vpop.f32.mrb[22].mxu0 }
 0xa4f   : > { %v1296_v17 = vadd.f32 %v1295_v11, %v1290_v13  ;;  %v1291_v18 = vadd.f32 %v1286_v16, %v1120_v56  ;;  %v1849_v19 = vpop.f32.mrb[23].mxu0  ;;  %v1909_v56 = vld [vmem:[%s2119_s24] sm:$0xff]   ;;  %s1961_s24 = scalar_lea.vmem %s1579_s16, 256 }
 0xa50   : > { %1859 = vmatpush3.bf16.msra.mxu0 %v1909_v56  ;;  %p1962_p6 = scmp.ne.s32.totalorder %s1579_s16, %s1961_s24  ;;  %p1969_p10 = scmp.lt.s32.totalorder %s1961_s24, %s1961_s24 }
 0xa51   : > { %v1297_v20 = vadd.f32 %v1295_v11, %v1291_v18  ;;  %v1298_v21 = vadd.f32 %v1296_v17, %v2137_v5  ;;  %1860 = vmatprep.subr.bf16.mxu0 %v1999_v3 }
 0xa52   : > { %p1963_p7 = pnand %p1962_p6, %p1874_p5  ;;  %p1970_p11 = por %p1969_p10, %p1968_p9 }
 0xa53   : > { %v1300_v22 = vsel %vm564_vm2, %v1298_v21, 0.0  ;;  %v1299_v23 = vadd.f32 %v1297_v20, %v2139_v6  ;;  %v1907_v6 = vld [vmem:[%s2108_s13] sm:$0xff]  }
 0xa54   : > { %1301 = vadd.xlane.f32.xlu1 %v1300_v22  ;;  %1851 = vmatpush3.bf16.msra.mxu1 %v1907_v6  ;;  %p1964_p8 = pneg %p1963_p7 }
 0xa55   : > { %v1303_v24 = vsel %vm564_vm2, %v1299_v23, 0.0  ;;  %1852 = vmatprep.subr.bf16.mxu1 %v1999_v3  ;;  %1861 = vmatpush3.bf16.msra.mxu0 %v1910_v57 }
 0xa56   : > { %1862 = vmatprep.subr.bf16.mxu0 %v1999_v3  ;;  %p1971_p12 = pnand %p1970_p11, %p1964_p8 }
 0xa58   : > { %1304 = vadd.xlane.f32.xlu1 %v1303_v24  ;;  %1853 = vmatpush3.bf16.msra.mxu1 %v1908_v36 }
 0xa59   : > { %1863 = vmatpush3.bf16.msra.mxu0 %v1911_v58 }
 0xa5a   : > { %1864 = vmatprep.subr.bf16.mxu0 %v1999_v3 }
 0xa5d   : > { %1865 = vmatpush3.bf16.msra.mxu0 %v1912_v59  ;;  %v1459_v59 = vsub.s32 1, %v2275_v8 }
 0xae1   : > { %v1302_v25 = vpop.xlane.xlu1 %1301 }
 0xae2   : > { %v1307_v26 = vmul.f32 0.03125, %v1302_v25 }
 0xae4   : > { %v1309_v27 = vsub.f32 %v1298_v21, %v1307_v26 }
 0xae5   : > { %v1305_v28 = vpop.xlane.xlu1 %1304 }
 0xae6   : > { %v1308_v29 = vmul.f32 0.03125, %v1305_v28  ;;  %v1311_v30 = vmul.f32 %v1309_v27, %v1309_v27 }
 0xae8   : > { %v1310_v33 = vsub.f32 %v1299_v23, %v1308_v29  ;;  %v1313_v34 = vsel %vm564_vm2, %v1311_v30, 0.0 }
 0xae9   : > { %1314 = vadd.xlane.f32.xlu1 %v1313_v34 }
 0xaea   : > { %v1312_v5 = vmul.f32 %v1310_v33, %v1310_v33 }
 0xaec   : > { %v1316_v35 = vsel %vm564_vm2, %v1312_v5, 0.0 }
 0xaed   : > { %1317 = vadd.xlane.f32.xlu1 %v1316_v35 }
 0xb76   : > { %v1315_v37 = vpop.xlane.xlu1 %1314 }
 0xb77   : > { %v1319_v38 = vmul.f32 0.03125, %v1315_v37 }
 0xb79   : > { %v1321_v39 = vadd.f32 1e-05, %v1319_v38 }
 0xb7a   : > { %v1318_v40 = vpop.xlane.xlu1 %1317 }
 0xb7b   : > { %1945 = vrsqrt.f32 %v1321_v39  ;;  %v1320_v41 = vmul.f32 0.03125, %v1318_v40 }
 0xb7d   : > { %v1322_v42 = vadd.f32 1e-05, %v1320_v41 }
 0xb7f   : > { %1947 = vrsqrt.f32 %v1322_v42 }
 0xb85   : > { %v1946_v44 = vpop.eup %1945 }
 0xb86   : > { %v1325_v31 = vmul.f32 %v1946_v44, %v1309_v27 }
 0xb88   : > { %v1331_v47 = vmul.f32 %v1330_v45, %v1325_v31 }
 0xb89   : > { %v1948_v32 = vpop.eup %1947 }
 0xb8a   : > { %v1326_v48 = vmul.f32 %v1948_v32, %v1310_v33  ;;  %v2295_v53 = vadd.f32 %v1336_v50, %v1331_v47 }
 0xb8c   : > { %v1332_v51 = vmul.f32 %v1330_v45, %v1326_v48 }
 0xb8e   : > { %v2297_v54 = vadd.f32 %v1336_v50, %v1332_v51 }
 0xb90   : > { %v1339_v55 = vpack.c.bf16 %v2297_v54, %v2295_v53 }
 0xb92   : > { %1855 = vmatmul.mubr.msk.bf16.vlgmr.msra.gmra.mrb[28].mxu1 %vm564_vm2, %v1339_v55 }
 0xc65   : > { %v1395_v15 = vpop.f32.mrb[28].mxu1 }
 0xc66   : > { %v1396_v61 = vadd.f32 %v1718_v60, %v1395_v15  ;;  %v1856_v62 = vpop.f32.mrb[29].mxu1 }
 0xc67   : > { %v1398_v63 = vpop.f32.mrb[30].mxu1 }
 0xc68   : > { %v1404_v0 = vmul.f32 0.70710677, %v1396_v61  ;;  %v1399_v49 = vadd.f32 %v1718_v60, %v1398_v63  ;;  %v1857_v52 = vpop.f32.mrb[31].mxu1  ;;  %v1402_v50 = vmul.f32 0.5, %v1396_v61  ;;  %v1460_v60 = vrot.slane %v2279_v10, %v1459_v59 }
 0xc6a   : > { %v1410_v1 = vand.u32 2147483647, %v1404_v0  ;;  %v1405_v2 = vmul.f32 0.70710677, %v1399_v49  ;;  %vm1406_vm8 = vcmp.ge.f32.partialorder %v1404_v0, 0.0  ;;  %v1403_v51 = vmul.f32 0.5, %v1399_v49 }
 0xc6b   : > { %v1408_v44 = vsel %vm1406_vm8, 1.0, %v2014_v43 }
 0xc6c   : > { %v1412_v4 = vmul.f32 0.3275911, %v1410_v1  ;;  %v1411_v7 = vand.u32 2147483647, %v1405_v2  ;;  %v1438_v12 = vsub.f32 0.0, %v1410_v1  ;;  %vm1407_vm9 = vcmp.ge.f32.partialorder %v1405_v2, 0.0 }
 0xc6d   : > { %v1409_v32 = vsel %vm1407_vm9, 1.0, %v2014_v43 }
 0xc6e   : > { %v1414_v9 = vadd.f32 1.0, %v1412_v4  ;;  %v1413_v3 = vmul.f32 0.3275911, %v1411_v7  ;;  %v1439_v13 = vsub.f32 0.0, %v1411_v7  ;;  %v1440_v16 = vmul.f32 %v1438_v12, %v1410_v1 }
 0xc70   : > { %1949 = vrcp.f32 %v1414_v9  ;;  %v1415_v11 = vadd.f32 1.0, %v1413_v3  ;;  %v1441_v20 = vmul.f32 %v1439_v13, %v1411_v7  ;;  %v1442_v21 = vmul.f32 1.442695, %v1440_v16 }
 0xc72   : > { %1951 = vrcp.f32 %v1415_v11  ;;  %v1444_v26 = vmul.f32 1.442695, %v1441_v20 }
 0xc73   : > { %1953 = vpow2.f32 %v1442_v21 }
 0xc74   : > { %1955 = vpow2.f32 %v1444_v26 }
 0xc7a   : > { %v1950_v14 = vpop.eup %1949 }
 0xc7b   : > { %v1420_v17 = vmul.f32 1.0614054, %v1950_v14 }
 0xc7c   : > { %v1952_v18 = vpop.eup %1951 }
 0xc7d   : > { %v1422_v19 = vadd.f32 -1.4531521, %v1420_v17  ;;  %v1421_v22 = vmul.f32 1.0614054, %v1952_v18  ;;  %v1954_v37 = vpop.eup %1953 }
 0xc7e   : > { %v1956_v41 = vpop.eup %1955 }
 0xc7f   : > { %v1424_v23 = vmul.f32 %v1950_v14, %v1422_v19  ;;  %v1423_v24 = vadd.f32 -1.4531521, %v1421_v22 }
 0xc81   : > { %v1426_v25 = vadd.f32 1.4214138, %v1424_v23  ;;  %v1425_v27 = vmul.f32 %v1952_v18, %v1423_v24  ;;  %v1560_v23 = vsub.s32 4, %v2275_v8  ;;  %v1566_v24 = vsub.s32 5, %v2275_v8 }
 0xc83   : > { %v1428_v28 = vmul.f32 %v1950_v14, %v1426_v25  ;;  %v1427_v29 = vadd.f32 1.4214138, %v1425_v27  ;;  %v1561_v25 = vrot.slane %v2279_v10, %v1560_v23 }
 0xc85   : > { %v1430_v30 = vadd.f32 -0.28449672, %v1428_v28  ;;  %v1429_v33 = vmul.f32 %v1952_v18, %v1427_v29  ;;  %v1567_v28 = vrot.slane %v2279_v10, %v1566_v24 }
 0xc87   : > { %v1432_v34 = vmul.f32 %v1950_v14, %v1430_v30  ;;  %v1431_v5 = vadd.f32 -0.28449672, %v1429_v33 }
 0xc89   : > { %v1434_v35 = vadd.f32 0.2548296, %v1432_v34  ;;  %v1433_v6 = vmul.f32 %v1952_v18, %v1431_v5 }
 0xc8b   : > { %v1436_v36 = vmul.f32 %v1950_v14, %v1434_v35  ;;  %v1435_v38 = vadd.f32 0.2548296, %v1433_v6 }
 0xc8d   : > { %v1446_v39 = vmul.f32 %v1954_v37, %v1436_v36  ;;  %v1437_v40 = vmul.f32 %v1952_v18, %v1435_v38 }
 0xc8f   : > { %v1448_v42 = vsub.f32 1.0, %v1446_v39  ;;  %v1447_v45 = vmul.f32 %v1956_v41, %v1437_v40 }
 0xc91   : > { %v1450_v31 = vmul.f32 %v1448_v42, %v1408_v44  ;;  %v1449_v46 = vsub.f32 1.0, %v1447_v45 }
 0xc93   : > { %v1452_v47 = vadd.f32 1.0, %v1450_v31  ;;  %v1451_v48 = vmul.f32 %v1449_v46, %v1409_v32 }
 0xc95   : > { %v1453_v55 = vadd.f32 1.0, %v1451_v48  ;;  %v1454_v56 = vmul.f32 %v1452_v47, %v1402_v50 }
 0xc97   : > { %v1455_v57 = vmul.f32 %v1453_v55, %v1403_v51 }
 0xc99   : > { %v1456_v58 = vpack.c.bf16 %v1455_v57, %v1454_v56 }
 0xc9b   : > { %1867 = vmatmul.mubr.msk.bf16.vlgmr.msra.gmra.mrb[24].mxu0 %vm1485_vm10, %v1456_v58 }
 0xd6e   : > { %v1523_v15 = vpop.f32.mrb[24].mxu0 }
 0xd6f   : > { %v1524_v62 = vadd.f32 %v1523_v15, %v1460_v60  ;;  %v1868_v63 = vpop.f32.mrb[25].mxu0 }
 0xd70   : > { %v1526_v0 = vpop.f32.mrb[26].mxu0 }
 0xd71   : > { %v1527_v52 = vadd.f32 %v1526_v0, %v1460_v60  ;;  %v1869_v1 = vpop.f32.mrb[27].mxu0  ;;  %v1530_v2 = vadd.f32 %v1524_v62, %v2295_v53 }
 0xd73   : > { %v1532_v61 = vsel %vm564_vm2, %v1530_v2, 0.0  ;;  %v1531_v49 = vadd.f32 %v1527_v52, %v2297_v54 }
 0xd74   : > { %1533 = vadd.xlane.f32.xlu1 %v1532_v61 }
 0xd75   : > { %v1535_v4 = vsel %vm564_vm2, %v1531_v49, 0.0 }
 0xd78   : > { %1536 = vadd.xlane.f32.xlu1 %v1535_v4 }
 0xe01   : > { %v1534_v7 = vpop.xlane.xlu1 %1533 }
 0xe02   : > { %v1538_v9 = vmul.f32 0.03125, %v1534_v7 }
 0xe04   : > { %v1540_v3 = vsub.f32 %v1530_v2, %v1538_v9 }
 0xe05   : > { %v1537_v11 = vpop.xlane.xlu1 %1536 }
 0xe06   : > { %v1539_v12 = vmul.f32 0.03125, %v1537_v11  ;;  %v1542_v13 = vmul.f32 %v1540_v3, %v1540_v3 }
 0xe08   : > { %v1541_v14 = vsub.f32 %v1531_v49, %v1539_v12  ;;  %v1544_v16 = vsel %vm564_vm2, %v1542_v13, 0.0 }
 0xe09   : > { %1545 = vadd.xlane.f32.xlu0 %v1544_v16 }
 0xe0a   : > { %v1543_v17 = vmul.f32 %v1541_v14, %v1541_v14 }
 0xe0c   : > { %v1547_v53 = vsel %vm564_vm2, %v1543_v17, 0.0 }
 0xe0d   : > { %1548 = vadd.xlane.f32.xlu1 %v1547_v53 }
 0xe96   : > { %v1546_v18 = vpop.xlane.xlu0 %1545 }
 0xe97   : > { %v1550_v54 = vmul.f32 0.03125, %v1546_v18 }
 0xe99   : > { %v1552_v19 = vadd.f32 1e-05, %v1550_v54 }
 0xe9a   : > { %v1549_v20 = vpop.xlane.xlu1 %1548 }
 0xe9b   : > { %1957 = vrsqrt.f32 %v1552_v19  ;;  %v1551_v21 = vmul.f32 0.03125, %v1549_v20 }
 0xe9d   : > { %v1553_v22 = vadd.f32 1e-05, %v1551_v21 }
 0xe9f   : > { %1959 = vrsqrt.f32 %v1553_v22 }
 0xea5   : > { %v1958_v26 = vpop.eup %1957 }
 0xea6   : > { %v1556_v27 = vmul.f32 %v1958_v26, %v1540_v3 }
 0xea8   : > { %v1562_v29 = vmul.f32 %v1561_v25, %v1556_v27 }
 0xea9   : > { %v1960_v30 = vpop.eup %1959 }
 0xeaa   : > { %v1557_v33 = vmul.f32 %v1960_v30, %v1541_v14  ;;  %v1568_v34 = vadd.f32 %v1567_v28, %v1562_v29 }
 0xeac   : > { %v1563_v5 = vmul.f32 %v1561_v25, %v1557_v33  ;;  %1570 = vst.msk [vmem:[#allocation2] sm:$0xff] %vm564_vm2, %v1568_v34 }
 0xeae   : > { %v1569_v35 = vadd.f32 %v1567_v28, %v1563_v5 }
 0xeb0   : > { %1571 = vst.msk [vmem:[#allocation2 + $0x8] sm:$0xff] %vm564_vm2, %v1569_v35 }
 0xeb1   : > { %1974 = shalt.err (!%p1971_p12)
}
 0xeb2   : > { %s1975_s14 = scalar_lea.hbm %s2365_s11, 256 }
 0xeb3   : > { %p1976_p13 = scmp.ne.s32.totalorder %s2365_s11, %s1975_s14  ;;  %p1981_p2 = scmp.lt.u32.totalorder %s1975_s14, %s2365_s11 }
 0xeb5   : > { %p1977_p0 = pnand %p1976_p13, %p1874_p5 }
 0xeb7   : > { %p1978_p1 = pneg %p1977_p0 }
 0xeb9   : > { %p1983_p3 = pnand %p1981_p2, %p1978_p1 }
 0xebb   : > { %1986 = shalt.err (!%p1983_p3)
}
 0xebc   : > { %s2016_s21 = smov 128   ;;  %s2017_s22 = smov 8  }
 0xebd   : > { %1871 = dma.vmem_to_hbm [thread:$0]  (%p1874_p5), %s1579_s16, 256, %s2365_s11, [#allocation3], %s2016_s21, %s2016_s21, %s2017_s22  }
 0xebe   : > { %1992 = dma.done.wait (%p1874_p5), [#allocation3], 256  }
 0xebf   : > { %1994 = vsyncadd (%p1874_p5), [#allocation3], 4294967040 }
 0xec0 PF: > { %s2369_s20 = sld [smem:[#allocation5_spill]] }
 0xec6   : > { %s22_s17 = sadd.s32 1, %s2369_s20  }
 0xec7   : > { %p19_p4 = scmp.ge.s32.totalorder %s22_s17, 4  }
 0xec9   :  { %21 = sbr.rel (!%p19_p4) target bundleno = 1 (0x1), region = 113 }
 0xed0   :  { %1594 = vsyncpa [#allocation3], 1 }
 0xed1   :  { %1596 = vsyncpa [#allocation3 + $0x1], 1 }

</bundles_post_ra>
